<compile_context>
chip_gen: v7x
topology: tpu7x:2x2x1
jax: 0.10.0
libtpu: 0.0.40
codegen_flags: <defaults>
</compile_context>

<pallas_src>
import math

import jax
import jax.numpy as jnp
from jax import lax
from jax.experimental import pallas as pl
from jax.experimental.pallas import tpu as pltpu


# ---------------------------------------------------------------------------
# Pallas kernel 1: fused netD+netA per-pixel MLP (1x1 conv -> relu -> 1x1 conv)
#   x: (C, tn) pixels-on-lanes, W1T: (2*hid, C), W2T (block-diag): (7, 2*hid)
#   feat out (bf16): [depth_raw, bump(3), albedo01(3)]   (lane-dense stores)
#   mm out  (f32) : per-(b, tile) broadcast min/max of the raw depth channel
# ---------------------------------------------------------------------------
def _pixel_mlp_kernel(x_ref, w1_ref, b1_ref, w2_ref, b2_ref, feat_ref, mm_ref):
    x = x_ref[0]                                                   # (C, tn) f32
    h = jnp.dot(w1_ref[...], x, preferred_element_type=jnp.float32)
    h = jnp.maximum(h + b1_ref[...], 0.0)                          # (2*hid, tn)
    o = jnp.dot(w2_ref[...], h, preferred_element_type=jnp.float32) + b2_ref[...]
    # rows 0..3: netD raw [depth, bump x3]; rows 4..6: netA albedo.
    # Albedo tanh + (x+1)/2 fused here: the EUP slot is idle in this
    # DMA/MXU-light kernel, and it removes 3 tanh per pixel from compose.
    row = lax.broadcasted_iota(jnp.int32, o.shape, 0)
    o = jnp.where(row >= 4, (jnp.tanh(o) + 1.0) * 0.5, o)
    o_bf = o.astype(jnp.bfloat16)
    feat_ref[0] = o_bf                                             # (7, tn) bf16
    # Per-block min/max of the (bf16-rounded) raw depth channel so the global
    # depth normalization never has to re-read feat from HBM.
    d_row = o_bf[0:1, :].astype(jnp.float32)                       # (1, tn)
    mn = jnp.min(d_row, axis=1, keepdims=True)                     # (1, 1)
    mx = jnp.max(d_row, axis=1, keepdims=True)
    mm_ref[0, 0, 0:1, :] = jnp.broadcast_to(mn, (1, 128))
    mm_ref[0, 0, 1:2, :] = jnp.broadcast_to(mx, (1, 128))


def _pick_tile(n, max_tile=32768):
    """Largest multiple-of-128 divisor of n not exceeding max_tile."""
    best = 128
    t = 128
    while t <= min(n, max_tile):
        if n % t == 0:
            best = t
        t += 128
    return best


def fused_pixel_mlp(x_cn, w1t, b1, w2t, b2, tn):
    """x_cn: (B, C, N) -> feat (B, 7, N) bf16 + per-block depth min/max."""
    B, C, N = x_cn.shape
    hid2 = w1t.shape[0]
    cout = w2t.shape[0]
    T = N // tn
    return pl.pallas_call(
        _pixel_mlp_kernel,
        out_shape=(
            jax.ShapeDtypeStruct((B, cout, N), jnp.bfloat16),
            jax.ShapeDtypeStruct((B, T, 2, 128), jnp.float32),
        ),
        grid_spec=pltpu.PrefetchScalarGridSpec(
            num_scalar_prefetch=0,
            grid=(B, T),
            in_specs=[
                pl.BlockSpec((1, C, tn), lambda b, t: (b, 0, t)),
                pl.BlockSpec((hid2, C), lambda b, t: (0, 0)),
                pl.BlockSpec((hid2, 1), lambda b, t: (0, 0)),
                pl.BlockSpec((cout, hid2), lambda b, t: (0, 0)),
                pl.BlockSpec((cout, 1), lambda b, t: (0, 0)),
            ],
            out_specs=(
                pl.BlockSpec((1, cout, tn), lambda b, t: (b, 0, t)),
                pl.BlockSpec((1, 1, 2, 128), lambda b, t: (b, t, 0, 0)),
            ),
        ),
        compiler_params=pltpu.CompilerParams(
            dimension_semantics=("parallel", "parallel")),
    )(x_cn, w1t, b1, w2t, b2)


# ---------------------------------------------------------------------------
# Pallas kernel 2: derender composition, one image per grid step, operating on
# pixels laid out as a dense (R, 128) slab (R = H*W/128).
# ---------------------------------------------------------------------------
def _shift_pixels(x, s, lane_idx):
    """y[p] = x[(p + s) mod N] for pixels stored row-major as (R, 128)."""
    R = x.shape[0]
    q = (s // 128) % R
    r = s % 128
    if q:
        x = pltpu.roll(x, shift=(R - q) % R, axis=0)     # rows shifted by q
    if r == 0:
        return x
    a = pltpu.roll(x, shift=128 - r, axis=1)             # lane shift by r
    rshift = (R - 1) % R
    b = pltpu.roll(x, shift=rshift, axis=0) if rshift else x
    b = pltpu.roll(b, shift=128 - r, axis=1)
    return jnp.where(lane_idx < 128 - r, a, b)


def compose(feat, light_params, scal, consts, W):
    B, C, R, L = feat.shape        # C == 7, L == 128

    def kernel(feat_ref, light_ref, scal_ref, const_ref,
               depth_o, normal_o, albedo_o, diff_o, spec_o, img_o):
        f32 = jnp.float32
        bi = pl.program_id(0)

        dmin = scal_ref[0]          # global (whole-batch) min of recon_depth
        inv_range = scal_ref[1]     # 1 / (max - min + 1e-6)

        lane = lax.broadcasted_iota(jnp.int32, (R, 128), 1)

        edge_x = const_ref[0]       # 1 where a right neighbour exists
        edge_y = const_ref[1]       # 1 where a lower neighbour exists
        smask = const_ref[2]        # 5x5 avg-pool interior mask (get_mask)
        v0 = const_ref[3]
        v1 = const_ref[4]
        v2 = const_ref[5]

        # --- depth (normal_depth) ---
        d = 1.0 + feat_ref[0, 0].astype(f32) * 0.1       # depth_rescaler
        depth_o[0, 0] = 1.0 - (d - dmin) * inv_range

        # --- bump, L2 normalized over channel (rsqrt on EUP) ---
        b0 = feat_ref[0, 1].astype(f32)
        b1 = feat_ref[0, 2].astype(f32)
        b2 = feat_ref[0, 3].astype(f32)
        inv_bn = lax.rsqrt(jnp.maximum(b0 * b0 + b1 * b1 + b2 * b2, 1e-12))
        b0 = b0 * inv_bn
        b1 = b1 * inv_bn
        b2 = b2 * inv_bn

        # --- Renderer: depth -> surface normal via forward finite differences
        # (one-pixel / one-row shifts on the XLU, in flattened pixel order).
        # TODO(synk): the original Renderer module is not provided; a standard
        # finite-difference depth->normal substitute is used here.
        d_xn = _shift_pixels(d, 1, lane)     # d[h, w+1] (wrap masked by edge_x)
        d_yn = _shift_pixels(d, W, lane)     # d[h+1, w] (wrap masked by edge_y)
        n0 = -(d_xn - d) * edge_x
        n1 = -(d_yn - d) * edge_y
        inv_nn = lax.rsqrt(n0 * n0 + n1 * n1 + 1.0)
        n0 = n0 * inv_nn + b0
        n1 = n1 * inv_nn + b1
        n2 = inv_nn + b2
        inv_nn = lax.rsqrt(jnp.maximum(n0 * n0 + n1 * n1 + n2 * n2, 1e-12))
        n0 = n0 * inv_nn
        n1 = n1 * inv_nn
        n2 = n2 * inv_nn
        normal_o[0, 0] = (n0 + 1.0) * 0.5
        normal_o[0, 1] = (n1 + 1.0) * 0.5
        normal_o[0, 2] = (n2 + 1.0) * 0.5

        # --- albedo (already (tanh+1)/2 from kernel 1) and gamma-space albedo
        a0 = feat_ref[0, 4].astype(f32)
        a1 = feat_ref[0, 5].astype(f32)
        a2 = feat_ref[0, 6].astype(f32)
        albedo_o[0, 0] = a0
        albedo_o[0, 1] = a1
        albedo_o[0, 2] = a2
        ga0 = jnp.exp(2.2 * jnp.log(jnp.maximum(a0, 1e-12)))
        ga1 = jnp.exp(2.2 * jnp.log(jnp.maximum(a1, 1e-12)))
        ga2 = jnp.exp(2.2 * jnp.log(jnp.maximum(a2, 1e-12)))

        # --- per-image light scalars (SMEM) ---
        sa = light_ref[bi, 0]      # spec_alpha (rescaled)
        ss = light_ref[bi, 1]      # spec_strength
        la = light_ref[bi, 2]      # light_a
        lb = light_ref[bi, 3]      # light_b
        ldx = light_ref[bi, 4]
        ldy = light_ref[bi, 5]
        ldz = light_ref[bi, 6]

        # --- diffuse shading ---
        cos_t = n0 * ldx + n1 * ldy + n2 * ldz
        diffuse = jnp.maximum(cos_t, 0.0)
        diff_o[0, 0] = diffuse

        # --- specular shading ---
        two_cos = 2.0 * cos_t
        r0 = two_cos * n0 - ldx
        r1 = two_cos * n1 - ldy
        r2 = two_cos * n2 - ldz
        spec = jnp.maximum(v0 * r0 + v1 * r1 + v2 * r2, 0.0)
        spec = spec * (cos_t > 0.0).astype(f32) * smask
        spec = jnp.clip(spec, 1e-6, 1.0 - 1e-6)
        spec_sh = jnp.exp(sa * jnp.log(spec))            # spec ** spec_alpha
        spec_o[0, 0] = spec_sh

        # --- final image (common terms hoisted out of the channel loop) ---
        shading = la + lb * diffuse
        spec_term = spec_sh * ss
        inv_gamma = 1.0 / 2.2
        for ga, cidx in ((ga0, 0), (ga1, 1), (ga2, 2)):
            img = ga * shading + spec_term
            img = jnp.exp(inv_gamma * jnp.log(jnp.maximum(img, 1e-7)))
            img_o[0, cidx] = jnp.clip(img, 0.0, 1.0)

    def blk(c):
        return pl.BlockSpec((1, c, R, 128), lambda b: (b, 0, 0, 0))

    # Explicit scoped-VMEM budget from the per-image block footprint
    # (double-buffered inputs/outputs) with generous headroom.
    # TODO(synk): for very large images / v7x, add an intra-image grid axis
    # (row tiles with a 1-row halo) instead of growing the per-image block.
    in_bytes = C * R * 128 * 2 + 6 * R * 128 * 4
    out_bytes = 12 * R * 128 * 4
    vmem_limit = int(min(max(2 * (in_bytes + out_bytes) + (8 << 20), 32 << 20),
                         128 << 20))

    return pl.pallas_call(
        kernel,
        out_shape=(
            jax.ShapeDtypeStruct((B, 1, R, 128), jnp.float32),  # depth
            jax.ShapeDtypeStruct((B, 3, R, 128), jnp.float32),  # normal
            jax.ShapeDtypeStruct((B, 3, R, 128), jnp.float32),  # albedo
            jax.ShapeDtypeStruct((B, 1, R, 128), jnp.float32),  # diffuse
            jax.ShapeDtypeStruct((B, 1, R, 128), jnp.float32),  # specular
            jax.ShapeDtypeStruct((B, 3, R, 128), jnp.float32),  # image
        ),
        grid_spec=pltpu.PrefetchScalarGridSpec(
            num_scalar_prefetch=0,
            grid=(B,),
            in_specs=[
                blk(C),
                pl.BlockSpec(memory_space=pltpu.MemorySpace.SMEM),  # (B, 8) lights
                pl.BlockSpec(memory_space=pltpu.MemorySpace.SMEM),  # (2,) depth scalars
                pl.BlockSpec((6, R, 128), lambda b: (0, 0, 0)),     # const planes
            ],
            out_specs=(blk(1), blk(3), blk(3), blk(1), blk(1), blk(3)),
        ),
        compiler_params=pltpu.CompilerParams(
            dimension_semantics=("parallel",),
            vmem_limit_bytes=vmem_limit),
    )(feat, light_params, scal, consts)


# ---------------------------------------------------------------------------
# glue
# ---------------------------------------------------------------------------
def get_view_d(fov, H, W):
    t = math.tan(fov / 360.0 * math.pi)
    xh = jnp.linspace(-1.0, 1.0, H) * t
    yw = jnp.linspace(-1.0, 1.0, W) * t
    xx, yy = jnp.meshgrid(xh, yw, indexing="ij")
    v = jnp.stack([yy, xx, jnp.ones_like(xx)], axis=0)
    v = v / jnp.linalg.norm(v, axis=0, keepdims=True)
    v = v[:, ::-1, ::-1]
    return v.astype(jnp.float32)


def derender_forward(image, params):
    """image: (B, 3, H, W) float32 in [0, 1] (NCHW, like the PyTorch module)."""
    B, C, H, W = image.shape
    N = H * W
    # TODO(synk): compose's dense (N/128, 128) pixel layout assumes
    # H*W % 128 == 0 (true for the typical 16/64/128/224/256 sizes).
    assert N % 128 == 0, "H*W must be a multiple of 128"
    R = N // 128

    x = (image - 0.5) * 2.0
    x_cn = x.reshape(B, C, N)          # NCHW -> (B, C, H*W): free, no transpose

    # TODO(synk): netD_model / netA_model backbones are not provided; they are
    # substituted by per-pixel 1x1-conv MLPs (fused into one Pallas kernel).
    pD, pA, pL = params["D"], params["A"], params["L"]
    hid = pD["w1"].shape[1]
    w1t = jnp.concatenate([pD["w1"], pA["w1"]], axis=1).T          # (2*hid, 3)
    b1 = jnp.concatenate([pD["b1"], pA["b1"]], axis=1).T           # (2*hid, 1)
    # fused block-diagonal head: rows 0-3 = netD [depth, bump], rows 4-6 =
    # netA albedo (netA's 4th "spec" output is never consumed -> dropped).
    w2t = jnp.zeros((7, 2 * hid), jnp.float32)
    w2t = w2t.at[:4, :hid].set(pD["w2"].T)
    w2t = w2t.at[4:, hid:].set(pA["w2"][:, :3].T)
    b2 = jnp.concatenate([pD["b2"][:, :4], pA["b2"][:, :3]], axis=1).T  # (7, 1)

    tn = _pick_tile(N)
    feat, mm = fused_pixel_mlp(x_cn, w1t, b1, w2t, b2, tn)   # (B,7,N) bf16

    # Global (whole-batch) depth min / range from the per-block partials
    # emitted by kernel 1 (no HBM re-read of feat).
    dmin = 1.0 + 0.1 * jnp.min(mm[:, :, 0, :])
    dmax = 1.0 + 0.1 * jnp.max(mm[:, :, 1, :])
    scal = jnp.stack([dmin, 1.0 / (dmax - dmin + 1e-6)]).astype(jnp.float32)

    feat = feat.reshape(B, 7, R, 128)    # free reshape (row-major compatible)

    # TODO(synk): netL_model is not provided; substituted by global-average-pool
    # + tiny MLP producing the 6 light scalars (plain-JAX glue, B x 3 only).
    pooled = jnp.mean(x_cn, axis=2)                                 # (B, 3)
    hl = jnp.maximum(pooled @ pL["w1"] + pL["b1"], 0.0)
    light_raw = hl @ pL["w2"] + pL["b2"]                            # (B, 6)

    lt = jnp.tanh(light_raw)
    spec_alpha = ((lt[:, 0] + 1.0) * 3.5 + 1.0) ** 2.0              # spec_alpha_rescaler
    spec_strength = (lt[:, 5] * 0.5 + 0.5) * 0.5
    spec_strength = spec_strength * 2.0 * (0.5 - 0.1) + 0.1
    light_a = lt[:, 1] * 0.5 + 0.5
    light_b = lt[:, 2] * 0.5 + 0.5
    ld = jnp.concatenate([lt[:, 3:5], jnp.ones((B, 1), jnp.float32)], axis=1)
    ld = ld / jnp.linalg.norm(ld, axis=1, keepdims=True)
    light_params = jnp.stack(
        [spec_alpha, spec_strength, light_a, light_b,
         ld[:, 0], ld[:, 1], ld[:, 2], jnp.zeros((B,), jnp.float32)],
        axis=1).astype(jnp.float32)                                 # (B, 8)

    # Constant per-pixel planes (edge masks, 5x5 interior mask, view dirs),
    # computed once here instead of per grid step inside the kernel.
    hi = jnp.broadcast_to(jnp.arange(H)[:, None], (H, W))
    wi = jnp.broadcast_to(jnp.arange(W)[None, :], (H, W))
    edge_x = (wi < W - 1).astype(jnp.float32)
    edge_y = (hi < H - 1).astype(jnp.float32)
    smask = ((hi >= 2) & (hi < H - 2) & (wi >= 2) & (wi < W - 2)).astype(jnp.float32)
    view_d = get_view_d(10.0, H, W)                                 # (3, H, W)
    consts = jnp.concatenate(
        [edge_x[None], edge_y[None], smask[None], view_d],
        axis=0).astype(jnp.float32).reshape(6, R, 128)

    depth, normal, albedo, diffuse, specular, recon = compose(
        feat, light_params, scal, consts, W)

    def unflat(a):
        return a.reshape(a.shape[0], a.shape[1], H, W)

    return {
        "depth": unflat(depth),
        "normal": unflat(normal),
        "albedo": unflat(albedo),
        "diffuse_shading": unflat(diffuse),
        "specular_shading": unflat(specular),
        "image": unflat(recon),
    }


def init_params(key, hidden=32):
    ks = jax.random.split(key, 6)

    def lin(k, fan_in, fan_out):
        return jax.random.normal(k, (fan_in, fan_out), jnp.float32) / math.sqrt(fan_in)

    return {
        "D": {"w1": lin(ks[0], 3, hidden),
              "b1": jnp.zeros((1, hidden), jnp.float32),
              "w2": lin(ks[1], hidden, 4),
              # nonzero bump bias keeps the channel normalization well-posed
              "b2": jnp.array([[0.0, 0.2, 0.2, 0.6]], jnp.float32)},
        "A": {"w1": lin(ks[2], 3, hidden),
              "b1": jnp.zeros((1, hidden), jnp.float32),
              "w2": lin(ks[3], hidden, 4),
              "b2": jnp.zeros((1, 4), jnp.float32)},
        "L": {"w1": lin(ks[4], 3, hidden),
              "b1": jnp.zeros((hidden,), jnp.float32),
              "w2": lin(ks[5], hidden, 6),
              "b2": jnp.zeros((6,), jnp.float32)},
    }


if __name__ == "__main__":
    key = jax.random.PRNGKey(0)
    k_img, k_par = jax.random.split(key)
    B, C, H, W = 2, 3, 16, 16
    image = jax.random.uniform(k_img, (B, C, H, W), jnp.float32)   # pixels in [0, 1]
    params = init_params(k_par)

    fwd = jax.jit(derender_forward)
    out = fwd(image, params)
    out = jax.block_until_ready(out)

    assert out["image"].shape == (B, 3, H, W)
    assert out["depth"].shape == (B, 1, H, W)
    assert out["normal"].shape == (B, 3, H, W)
    assert out["albedo"].shape == (B, 3, H, W)
    assert out["diffuse_shading"].shape == (B, 1, H, W)
    assert out["specular_shading"].shape == (B, 1, H, W)
    for v in out.values():
        assert bool(jnp.all(jnp.isfinite(v)))
    print("KERNEL_OK")
</pallas_src>

<mosaic_0001>
module attributes {stable_mosaic.version = 11 : i64} {
  func.func @_pixel_mlp_kernel(%arg0: i32, %arg1: i32, %arg2: memref<1x3x256xf32, #tpu.memory_space<vmem>>, %arg3: memref<64x3xf32, #tpu.memory_space<vmem>>, %arg4: memref<64x1xf32, #tpu.memory_space<vmem>>, %arg5: memref<7x64xf32, #tpu.memory_space<vmem>>, %arg6: memref<7x1xf32, #tpu.memory_space<vmem>>, %arg7: memref<1x7x256xbf16, #tpu.memory_space<vmem>>, %arg8: memref<1x1x2x128xf32, #tpu.memory_space<vmem>>) attributes {dimension_semantics = [#tpu.dimension_semantics<parallel>, #tpu.dimension_semantics<parallel>], iteration_bounds = array<i64: 2, 1>, scalar_prefetch = 0 : i64, scratch_operands = 0 : i64, tpu.core_type = #tpu.core_type<tc>, window_params = [{transform_indices = @transform_0, window_bounds = array<i64: 1, 3, 256>}, {pipeline_mode = #tpu.pipeline_mode<synchronous>, transform_indices = @transform_1, window_bounds = array<i64: 64, 3>}, {pipeline_mode = #tpu.pipeline_mode<synchronous>, transform_indices = @transform_2, window_bounds = array<i64: 64, 1>}, {pipeline_mode = #tpu.pipeline_mode<synchronous>, transform_indices = @transform_3, window_bounds = array<i64: 7, 64>}, {pipeline_mode = #tpu.pipeline_mode<synchronous>, transform_indices = @transform_4, window_bounds = array<i64: 7, 1>}, {transform_indices = @transform_5, window_bounds = array<i64: 1, 7, 256>}, {transform_indices = @transform_6, window_bounds = array<i64: 1, 1, 2, 128>}]} {
    %c0 = arith.constant 0 : index
    %c0_0 = arith.constant 0 : index
    %c0_1 = arith.constant 0 : index
    %0 = vector.load %arg2[%c0, %c0_0, %c0_1] : memref<1x3x256xf32, #tpu.memory_space<vmem>>, vector<1x3x256xf32>
    %1 = vector.shape_cast %0 : vector<1x3x256xf32> to vector<3x256xf32>
    %c0_2 = arith.constant 0 : index
    %c0_3 = arith.constant 0 : index
    %2 = vector.load %arg3[%c0_2, %c0_3] : memref<64x3xf32, #tpu.memory_space<vmem>>, vector<64x3xf32>
    %cst = arith.constant dense<0.000000e+00> : vector<64x256xf32>
    %3 = tpu.matmul %2, %1, %cst {dimension_numbers = #tpu.dot_dimension_numbers<[1], [0], [0], [1], [0, 0, 1, 1], [], []>} : vector<64x3xf32>, vector<3x256xf32>, vector<64x256xf32> -> vector<64x256xf32>
    %c0_4 = arith.constant 0 : index
    %c0_5 = arith.constant 0 : index
    %4 = vector.load %arg4[%c0_4, %c0_5] : memref<64x1xf32, #tpu.memory_space<vmem>>, vector<64x1xf32>
    %5 = vector.broadcast %4 : vector<64x1xf32> to vector<64x256xf32>
    %6 = arith.addf %3, %5 : vector<64x256xf32>
    %cst_6 = arith.constant 0.000000e+00 : f32
    %7 = vector.broadcast %cst_6 : f32 to vector<64x256xf32>
    %8 = arith.maximumf %6, %7 : vector<64x256xf32>
    %c0_7 = arith.constant 0 : index
    %c0_8 = arith.constant 0 : index
    %9 = vector.load %arg5[%c0_7, %c0_8] : memref<7x64xf32, #tpu.memory_space<vmem>>, vector<7x64xf32>
    %cst_9 = arith.constant dense<0.000000e+00> : vector<7x256xf32>
    %10 = tpu.matmul %9, %8, %cst_9 {dimension_numbers = #tpu.dot_dimension_numbers<[1], [0], [0], [1], [0, 0, 1, 1], [], []>} : vector<7x64xf32>, vector<64x256xf32>, vector<7x256xf32> -> vector<7x256xf32>
    %c0_10 = arith.constant 0 : index
    %c0_11 = arith.constant 0 : index
    %11 = vector.load %arg6[%c0_10, %c0_11] : memref<7x1xf32, #tpu.memory_space<vmem>>, vector<7x1xf32>
    %12 = vector.broadcast %11 : vector<7x1xf32> to vector<7x256xf32>
    %13 = arith.addf %10, %12 : vector<7x256xf32>
    %14 = tpu.iota {dimensions = array<i32: 0>} : vector<7x256xi32>
    %c4_i32 = arith.constant 4 : i32
    %15 = vector.broadcast %c4_i32 : i32 to vector<7x256xi32>
    %16 = arith.cmpi sge, %14, %15 : vector<7x256xi32>
    %17 = math.tanh %13 : vector<7x256xf32>
    %cst_12 = arith.constant 1.000000e+00 : f32
    %18 = vector.broadcast %cst_12 : f32 to vector<7x256xf32>
    %19 = arith.addf %17, %18 : vector<7x256xf32>
    %cst_13 = arith.constant 5.000000e-01 : f32
    %20 = vector.broadcast %cst_13 : f32 to vector<7x256xf32>
    %21 = arith.mulf %19, %20 : vector<7x256xf32>
    %22 = arith.select %16, %21, %13 : vector<7x256xi1>, vector<7x256xf32>
    %23 = arith.truncf %22 : vector<7x256xf32> to vector<7x256xbf16>
    %c0_14 = arith.constant 0 : index
    %c0_15 = arith.constant 0 : index
    %c0_16 = arith.constant 0 : index
    %24 = vector.load %arg7[%c0_14, %c0_15, %c0_16] : memref<1x7x256xbf16, #tpu.memory_space<vmem>>, vector<1x7x256xbf16>
    %25 = vector.shape_cast %24 : vector<1x7x256xbf16> to vector<7x256xbf16>
    %26 = vector.shape_cast %23 : vector<7x256xbf16> to vector<1x7x256xbf16>
    tpu.vector_store %arg7[%c0_14, %c0_15, %c0_16], %26 {strides = array<i32>} : memref<1x7x256xbf16, #tpu.memory_space<vmem>>, vector<1x7x256xbf16>,
    %27 = vector.extract_strided_slice %23 {offsets = [0, 0], sizes = [1, 256], strides = [1, 1]} : vector<7x256xbf16> to vector<1x256xbf16>
    %28 = arith.extf %27 : vector<1x256xbf16> to vector<1x256xf32>
    %cst_17 = arith.constant dense<0x7F800000> : vector<1xf32>
    %29 = vector.multi_reduction <minimumf>, %28, %cst_17 [1] : vector<1x256xf32> to vector<1xf32>
    %30 = vector.shape_cast %29 : vector<1xf32> to vector<1x1xf32>
    %cst_18 = arith.constant dense<0xFF800000> : vector<1xf32>
    %31 = vector.multi_reduction <maximumf>, %28, %cst_18 [1] : vector<1x256xf32> to vector<1xf32>
    %32 = vector.shape_cast %31 : vector<1xf32> to vector<1x1xf32>
    %33 = vector.shape_cast %30 : vector<1x1xf32> to vector<1x1xf32>
    %34 = vector.broadcast %33 : vector<1x1xf32> to vector<1x128xf32>
    %c0_19 = arith.constant 0 : index
    %c0_20 = arith.constant 0 : index
    %c0_21 = arith.constant 0 : index
    %c0_22 = arith.constant 0 : index
    %35 = vector.load %arg8[%c0_19, %c0_20, %c0_21, %c0_22] : memref<1x1x2x128xf32, #tpu.memory_space<vmem>>, vector<1x1x1x128xf32>
    %36 = vector.shape_cast %35 : vector<1x1x1x128xf32> to vector<1x128xf32>
    %37 = vector.shape_cast %34 : vector<1x128xf32> to vector<1x1x1x128xf32>
    tpu.vector_store %arg8[%c0_19, %c0_20, %c0_21, %c0_22], %37 {strides = array<i32>} : memref<1x1x2x128xf32, #tpu.memory_space<vmem>>, vector<1x1x1x128xf32>,
    %38 = vector.shape_cast %32 : vector<1x1xf32> to vector<1x1xf32>
    %39 = vector.broadcast %38 : vector<1x1xf32> to vector<1x128xf32>
    %c0_23 = arith.constant 0 : index
    %c0_24 = arith.constant 0 : index
    %c1 = arith.constant 1 : index
    %c0_25 = arith.constant 0 : index
    %40 = vector.load %arg8[%c0_23, %c0_24, %c1, %c0_25] : memref<1x1x2x128xf32, #tpu.memory_space<vmem>>, vector<1x1x1x128xf32>
    %41 = vector.shape_cast %40 : vector<1x1x1x128xf32> to vector<1x128xf32>
    %42 = vector.shape_cast %39 : vector<1x128xf32> to vector<1x1x1x128xf32>
    tpu.vector_store %arg8[%c0_23, %c0_24, %c1, %c0_25], %42 {strides = array<i32>} : memref<1x1x2x128xf32, #tpu.memory_space<vmem>>, vector<1x1x1x128xf32>,
    return
  }
  func.func @transform_0(%arg0: i32, %arg1: i32) -> (i32, i32, i32) {
    %c0_i32 = arith.constant 0 : i32
    %c0_i32_0 = arith.constant 0 : i32
    return %arg0, %c0_i32, %arg1 : i32, i32, i32
  }
  func.func @transform_1(%arg0: i32, %arg1: i32) -> (i32, i32) {
    %c0_i32 = arith.constant 0 : i32
    %c0_i32_0 = arith.constant 0 : i32
    %c0_i32_1 = arith.constant 0 : i32
    return %c0_i32, %c0_i32_0 : i32, i32
  }
  func.func @transform_2(%arg0: i32, %arg1: i32) -> (i32, i32) {
    %c0_i32 = arith.constant 0 : i32
    %c0_i32_0 = arith.constant 0 : i32
    %c0_i32_1 = arith.constant 0 : i32
    return %c0_i32, %c0_i32_0 : i32, i32
  }
  func.func @transform_3(%arg0: i32, %arg1: i32) -> (i32, i32) {
    %c0_i32 = arith.constant 0 : i32
    %c0_i32_0 = arith.constant 0 : i32
    %c0_i32_1 = arith.constant 0 : i32
    return %c0_i32, %c0_i32_0 : i32, i32
  }
  func.func @transform_4(%arg0: i32, %arg1: i32) -> (i32, i32) {
    %c0_i32 = arith.constant 0 : i32
    %c0_i32_0 = arith.constant 0 : i32
    %c0_i32_1 = arith.constant 0 : i32
    return %c0_i32, %c0_i32_0 : i32, i32
  }
  func.func @transform_5(%arg0: i32, %arg1: i32) -> (i32, i32, i32) {
    %c0_i32 = arith.constant 0 : i32
    %c0_i32_0 = arith.constant 0 : i32
    return %arg0, %c0_i32, %arg1 : i32, i32, i32
  }
  func.func @transform_6(%arg0: i32, %arg1: i32) -> (i32, i32, i32, i32) {
    %c0_i32 = arith.constant 0 : i32
    %c0_i32_0 = arith.constant 0 : i32
    %c0_i32_1 = arith.constant 0 : i32
    return %arg0, %arg1, %c0_i32, %c0_i32_0 : i32, i32, i32, i32
  }
}

module attributes {stable_mosaic.version = 11 : i64} {
  func.func @kernel(%arg0: i32, %arg1: memref<1x7x2x128xbf16, #tpu.memory_space<vmem>>, %arg2: memref<2x8xf32, #tpu.memory_space<smem>>, %arg3: memref<2xf32, #tpu.memory_space<smem>>, %arg4: memref<6x2x128xf32, #tpu.memory_space<vmem>>, %arg5: memref<1x1x2x128xf32, #tpu.memory_space<vmem>>, %arg6: memref<1x3x2x128xf32, #tpu.memory_space<vmem>>, %arg7: memref<1x3x2x128xf32, #tpu.memory_space<vmem>>, %arg8: memref<1x1x2x128xf32, #tpu.memory_space<vmem>>, %arg9: memref<1x1x2x128xf32, #tpu.memory_space<vmem>>, %arg10: memref<1x3x2x128xf32, #tpu.memory_space<vmem>>) attributes {dimension_semantics = [#tpu.dimension_semantics<parallel>], iteration_bounds = array<i64: 2>, scalar_prefetch = 0 : i64, scratch_operands = 0 : i64, tpu.core_type = #tpu.core_type<tc>, window_params = [{transform_indices = @transform_0, window_bounds = array<i64: 1, 7, 2, 128>}, {transform_indices = @transform_1, window_bounds = array<i64: 2, 8>}, {transform_indices = @transform_2, window_bounds = array<i64: 2>}, {pipeline_mode = #tpu.pipeline_mode<synchronous>, transform_indices = @transform_3, window_bounds = array<i64: 6, 2, 128>}, {transform_indices = @transform_4, window_bounds = array<i64: 1, 1, 2, 128>}, {transform_indices = @transform_5, window_bounds = array<i64: 1, 3, 2, 128>}, {transform_indices = @transform_6, window_bounds = array<i64: 1, 3, 2, 128>}, {transform_indices = @transform_7, window_bounds = array<i64: 1, 1, 2, 128>}, {transform_indices = @transform_8, window_bounds = array<i64: 1, 1, 2, 128>}, {transform_indices = @transform_9, window_bounds = array<i64: 1, 3, 2, 128>}]} {
    %c0 = arith.constant 0 : index
    %0 = memref.load %arg3[%c0] : memref<2xf32, #tpu.memory_space<smem>>
    %c1 = arith.constant 1 : index
    %1 = memref.load %arg3[%c1] : memref<2xf32, #tpu.memory_space<smem>>
    %2 = tpu.iota {dimensions = array<i32: 1>} : vector<2x128xi32>
    %c0_0 = arith.constant 0 : index
    %c0_1 = arith.constant 0 : index
    %c0_2 = arith.constant 0 : index
    %3 = vector.load %arg4[%c0_0, %c0_1, %c0_2] : memref<6x2x128xf32, #tpu.memory_space<vmem>>, vector<1x2x128xf32>
    %4 = vector.shape_cast %3 : vector<1x2x128xf32> to vector<2x128xf32>
    %c1_3 = arith.constant 1 : index
    %c0_4 = arith.constant 0 : index
    %c0_5 = arith.constant 0 : index
    %5 = vector.load %arg4[%c1_3, %c0_4, %c0_5] : memref<6x2x128xf32, #tpu.memory_space<vmem>>, vector<1x2x128xf32>
    %6 = vector.shape_cast %5 : vector<1x2x128xf32> to vector<2x128xf32>
    %c2 = arith.constant 2 : index
    %c0_6 = arith.constant 0 : index
    %c0_7 = arith.constant 0 : index
    %7 = vector.load %arg4[%c2, %c0_6, %c0_7] : memref<6x2x128xf32, #tpu.memory_space<vmem>>, vector<1x2x128xf32>
    %8 = vector.shape_cast %7 : vector<1x2x128xf32> to vector<2x128xf32>
    %c3 = arith.constant 3 : index
    %c0_8 = arith.constant 0 : index
    %c0_9 = arith.constant 0 : index
    %9 = vector.load %arg4[%c3, %c0_8, %c0_9] : memref<6x2x128xf32, #tpu.memory_space<vmem>>, vector<1x2x128xf32>
    %10 = vector.shape_cast %9 : vector<1x2x128xf32> to vector<2x128xf32>
    %c4 = arith.constant 4 : index
    %c0_10 = arith.constant 0 : index
    %c0_11 = arith.constant 0 : index
    %11 = vector.load %arg4[%c4, %c0_10, %c0_11] : memref<6x2x128xf32, #tpu.memory_space<vmem>>, vector<1x2x128xf32>
    %12 = vector.shape_cast %11 : vector<1x2x128xf32> to vector<2x128xf32>
    %c5 = arith.constant 5 : index
    %c0_12 = arith.constant 0 : index
    %c0_13 = arith.constant 0 : index
    %13 = vector.load %arg4[%c5, %c0_12, %c0_13] : memref<6x2x128xf32, #tpu.memory_space<vmem>>, vector<1x2x128xf32>
    %14 = vector.shape_cast %13 : vector<1x2x128xf32> to vector<2x128xf32>
    %c0_14 = arith.constant 0 : index
    %c0_15 = arith.constant 0 : index
    %c0_16 = arith.constant 0 : index
    %c0_17 = arith.constant 0 : index
    %15 = vector.load %arg1[%c0_14, %c0_15, %c0_16, %c0_17] : memref<1x7x2x128xbf16, #tpu.memory_space<vmem>>, vector<1x1x2x128xbf16>
    %16 = vector.shape_cast %15 : vector<1x1x2x128xbf16> to vector<2x128xbf16>
    %17 = arith.extf %16 : vector<2x128xbf16> to vector<2x128xf32>
    %cst = arith.constant 1.000000e-01 : f32
    %18 = vector.broadcast %cst : f32 to vector<2x128xf32>
    %19 = arith.mulf %17, %18 : vector<2x128xf32>
    %cst_18 = arith.constant 1.000000e+00 : f32
    %20 = vector.broadcast %cst_18 : f32 to vector<2x128xf32>
    %21 = arith.addf %20, %19 : vector<2x128xf32>
    %22 = vector.broadcast %0 : f32 to vector<2x128xf32>
    %23 = arith.subf %21, %22 : vector<2x128xf32>
    %24 = vector.broadcast %1 : f32 to vector<2x128xf32>
    %25 = arith.mulf %23, %24 : vector<2x128xf32>
    %cst_19 = arith.constant 1.000000e+00 : f32
    %26 = vector.broadcast %cst_19 : f32 to vector<2x128xf32>
    %27 = arith.subf %26, %25 : vector<2x128xf32>
    %c0_20 = arith.constant 0 : index
    %c0_21 = arith.constant 0 : index
    %c0_22 = arith.constant 0 : index
    %c0_23 = arith.constant 0 : index
    %28 = vector.load %arg5[%c0_20, %c0_21, %c0_22, %c0_23] : memref<1x1x2x128xf32, #tpu.memory_space<vmem>>, vector<1x1x2x128xf32>
    %29 = vector.shape_cast %28 : vector<1x1x2x128xf32> to vector<2x128xf32>
    %30 = vector.shape_cast %27 : vector<2x128xf32> to vector<1x1x2x128xf32>
    tpu.vector_store %arg5[%c0_20, %c0_21, %c0_22, %c0_23], %30 {strides = array<i32>} : memref<1x1x2x128xf32, #tpu.memory_space<vmem>>, vector<1x1x2x128xf32>,
    %c0_24 = arith.constant 0 : index
    %c1_25 = arith.constant 1 : index
    %c0_26 = arith.constant 0 : index
    %c0_27 = arith.constant 0 : index
    %31 = vector.load %arg1[%c0_24, %c1_25, %c0_26, %c0_27] : memref<1x7x2x128xbf16, #tpu.memory_space<vmem>>, vector<1x1x2x128xbf16>
    %32 = vector.shape_cast %31 : vector<1x1x2x128xbf16> to vector<2x128xbf16>
    %33 = arith.extf %32 : vector<2x128xbf16> to vector<2x128xf32>
    %c0_28 = arith.constant 0 : index
    %c2_29 = arith.constant 2 : index
    %c0_30 = arith.constant 0 : index
    %c0_31 = arith.constant 0 : index
    %34 = vector.load %arg1[%c0_28, %c2_29, %c0_30, %c0_31] : memref<1x7x2x128xbf16, #tpu.memory_space<vmem>>, vector<1x1x2x128xbf16>
    %35 = vector.shape_cast %34 : vector<1x1x2x128xbf16> to vector<2x128xbf16>
    %36 = arith.extf %35 : vector<2x128xbf16> to vector<2x128xf32>
    %c0_32 = arith.constant 0 : index
    %c3_33 = arith.constant 3 : index
    %c0_34 = arith.constant 0 : index
    %c0_35 = arith.constant 0 : index
    %37 = vector.load %arg1[%c0_32, %c3_33, %c0_34, %c0_35] : memref<1x7x2x128xbf16, #tpu.memory_space<vmem>>, vector<1x1x2x128xbf16>
    %38 = vector.shape_cast %37 : vector<1x1x2x128xbf16> to vector<2x128xbf16>
    %39 = arith.extf %38 : vector<2x128xbf16> to vector<2x128xf32>
    %40 = arith.mulf %33, %33 : vector<2x128xf32>
    %41 = arith.mulf %36, %36 : vector<2x128xf32>
    %42 = arith.addf %40, %41 : vector<2x128xf32>
    %43 = arith.mulf %39, %39 : vector<2x128xf32>
    %44 = arith.addf %42, %43 : vector<2x128xf32>
    %cst_36 = arith.constant 9.99999996E-13 : f32
    %45 = vector.broadcast %cst_36 : f32 to vector<2x128xf32>
    %46 = arith.maximumf %44, %45 : vector<2x128xf32>
    %47 = math.rsqrt %46 : vector<2x128xf32>
    %48 = arith.mulf %33, %47 : vector<2x128xf32>
    %49 = arith.mulf %36, %47 : vector<2x128xf32>
    %50 = arith.mulf %39, %47 : vector<2x128xf32>
    %c127_i32 = arith.constant 127 : i32
    %51 = tpu.dynamic_rotate %21 by %c127_i32 dim 1 : vector<2x128xf32>, i32 -> vector<2x128xf32>
    %c1_i32 = arith.constant 1 : i32
    %52 = tpu.dynamic_rotate %21 by %c1_i32 dim 0 : vector<2x128xf32>, i32 -> vector<2x128xf32>
    %c127_i32_37 = arith.constant 127 : i32
    %53 = tpu.dynamic_rotate %52 by %c127_i32_37 dim 1 : vector<2x128xf32>, i32 -> vector<2x128xf32>
    %c127_i32_38 = arith.constant 127 : i32
    %54 = vector.broadcast %c127_i32_38 : i32 to vector<2x128xi32>
    %55 = arith.cmpi slt, %2, %54 : vector<2x128xi32>
    %56 = arith.select %55, %51, %53 : vector<2x128xi1>, vector<2x128xf32>
    %c112_i32 = arith.constant 112 : i32
    %57 = tpu.dynamic_rotate %21 by %c112_i32 dim 1 : vector<2x128xf32>, i32 -> vector<2x128xf32>
    %c1_i32_39 = arith.constant 1 : i32
    %58 = tpu.dynamic_rotate %21 by %c1_i32_39 dim 0 : vector<2x128xf32>, i32 -> vector<2x128xf32>
    %c112_i32_40 = arith.constant 112 : i32
    %59 = tpu.dynamic_rotate %58 by %c112_i32_40 dim 1 : vector<2x128xf32>, i32 -> vector<2x128xf32>
    %c112_i32_41 = arith.constant 112 : i32
    %60 = vector.broadcast %c112_i32_41 : i32 to vector<2x128xi32>
    %61 = arith.cmpi slt, %2, %60 : vector<2x128xi32>
    %62 = arith.select %61, %57, %59 : vector<2x128xi1>, vector<2x128xf32>
    %63 = arith.subf %56, %21 : vector<2x128xf32>
    %cst_42 = arith.constant 0.000000e+00 : f32
    %64 = vector.broadcast %cst_42 : f32 to vector<2x128xf32>
    %65 = arith.subf %64, %63 : vector<2x128xf32>
    %66 = arith.mulf %65, %4 : vector<2x128xf32>
    %67 = arith.subf %62, %21 : vector<2x128xf32>
    %cst_43 = arith.constant 0.000000e+00 : f32
    %68 = vector.broadcast %cst_43 : f32 to vector<2x128xf32>
    %69 = arith.subf %68, %67 : vector<2x128xf32>
    %70 = arith.mulf %69, %6 : vector<2x128xf32>
    %71 = arith.mulf %66, %66 : vector<2x128xf32>
    %72 = arith.mulf %70, %70 : vector<2x128xf32>
    %73 = arith.addf %71, %72 : vector<2x128xf32>
    %cst_44 = arith.constant 1.000000e+00 : f32
    %74 = vector.broadcast %cst_44 : f32 to vector<2x128xf32>
    %75 = arith.addf %73, %74 : vector<2x128xf32>
    %76 = math.rsqrt %75 : vector<2x128xf32>
    %77 = arith.mulf %66, %76 : vector<2x128xf32>
    %78 = arith.addf %77, %48 : vector<2x128xf32>
    %79 = arith.mulf %70, %76 : vector<2x128xf32>
    %80 = arith.addf %79, %49 : vector<2x128xf32>
    %81 = arith.addf %76, %50 : vector<2x128xf32>
    %82 = arith.mulf %78, %78 : vector<2x128xf32>
    %83 = arith.mulf %80, %80 : vector<2x128xf32>
    %84 = arith.addf %82, %83 : vector<2x128xf32>
    %85 = arith.mulf %81, %81 : vector<2x128xf32>
    %86 = arith.addf %84, %85 : vector<2x128xf32>
    %cst_45 = arith.constant 9.99999996E-13 : f32
    %87 = vector.broadcast %cst_45 : f32 to vector<2x128xf32>
    %88 = arith.maximumf %86, %87 : vector<2x128xf32>
    %89 = math.rsqrt %88 : vector<2x128xf32>
    %90 = arith.mulf %78, %89 : vector<2x128xf32>
    %91 = arith.mulf %80, %89 : vector<2x128xf32>
    %92 = arith.mulf %81, %89 : vector<2x128xf32>
    %cst_46 = arith.constant 1.000000e+00 : f32
    %93 = vector.broadcast %cst_46 : f32 to vector<2x128xf32>
    %94 = arith.addf %90, %93 : vector<2x128xf32>
    %cst_47 = arith.constant 5.000000e-01 : f32
    %95 = vector.broadcast %cst_47 : f32 to vector<2x128xf32>
    %96 = arith.mulf %94, %95 : vector<2x128xf32>
    %c0_48 = arith.constant 0 : index
    %c0_49 = arith.constant 0 : index
    %c0_50 = arith.constant 0 : index
    %c0_51 = arith.constant 0 : index
    %97 = vector.load %arg6[%c0_48, %c0_49, %c0_50, %c0_51] : memref<1x3x2x128xf32, #tpu.memory_space<vmem>>, vector<1x1x2x128xf32>
    %98 = vector.shape_cast %97 : vector<1x1x2x128xf32> to vector<2x128xf32>
    %99 = vector.shape_cast %96 : vector<2x128xf32> to vector<1x1x2x128xf32>
    tpu.vector_store %arg6[%c0_48, %c0_49, %c0_50, %c0_51], %99 {strides = array<i32>} : memref<1x3x2x128xf32, #tpu.memory_space<vmem>>, vector<1x1x2x128xf32>,
    %cst_52 = arith.constant 1.000000e+00 : f32
    %100 = vector.broadcast %cst_52 : f32 to vector<2x128xf32>
    %101 = arith.addf %91, %100 : vector<2x128xf32>
    %cst_53 = arith.constant 5.000000e-01 : f32
    %102 = vector.broadcast %cst_53 : f32 to vector<2x128xf32>
    %103 = arith.mulf %101, %102 : vector<2x128xf32>
    %c0_54 = arith.constant 0 : index
    %c1_55 = arith.constant 1 : index
    %c0_56 = arith.constant 0 : index
    %c0_57 = arith.constant 0 : index
    %104 = vector.load %arg6[%c0_54, %c1_55, %c0_56, %c0_57] : memref<1x3x2x128xf32, #tpu.memory_space<vmem>>, vector<1x1x2x128xf32>
    %105 = vector.shape_cast %104 : vector<1x1x2x128xf32> to vector<2x128xf32>
    %106 = vector.shape_cast %103 : vector<2x128xf32> to vector<1x1x2x128xf32>
    tpu.vector_store %arg6[%c0_54, %c1_55, %c0_56, %c0_57], %106 {strides = array<i32>} : memref<1x3x2x128xf32, #tpu.memory_space<vmem>>, vector<1x1x2x128xf32>,
    %cst_58 = arith.constant 1.000000e+00 : f32
    %107 = vector.broadcast %cst_58 : f32 to vector<2x128xf32>
    %108 = arith.addf %92, %107 : vector<2x128xf32>
    %cst_59 = arith.constant 5.000000e-01 : f32
    %109 = vector.broadcast %cst_59 : f32 to vector<2x128xf32>
    %110 = arith.mulf %108, %109 : vector<2x128xf32>
    %c0_60 = arith.constant 0 : index
    %c2_61 = arith.constant 2 : index
    %c0_62 = arith.constant 0 : index
    %c0_63 = arith.constant 0 : index
    %111 = vector.load %arg6[%c0_60, %c2_61, %c0_62, %c0_63] : memref<1x3x2x128xf32, #tpu.memory_space<vmem>>, vector<1x1x2x128xf32>
    %112 = vector.shape_cast %111 : vector<1x1x2x128xf32> to vector<2x128xf32>
    %113 = vector.shape_cast %110 : vector<2x128xf32> to vector<1x1x2x128xf32>
    tpu.vector_store %arg6[%c0_60, %c2_61, %c0_62, %c0_63], %113 {strides = array<i32>} : memref<1x3x2x128xf32, #tpu.memory_space<vmem>>, vector<1x1x2x128xf32>,
    %c0_64 = arith.constant 0 : index
    %c4_65 = arith.constant 4 : index
    %c0_66 = arith.constant 0 : index
    %c0_67 = arith.constant 0 : index
    %114 = vector.load %arg1[%c0_64, %c4_65, %c0_66, %c0_67] : memref<1x7x2x128xbf16, #tpu.memory_space<vmem>>, vector<1x1x2x128xbf16>
    %115 = vector.shape_cast %114 : vector<1x1x2x128xbf16> to vector<2x128xbf16>
    %116 = arith.extf %115 : vector<2x128xbf16> to vector<2x128xf32>
    %c0_68 = arith.constant 0 : index
    %c5_69 = arith.constant 5 : index
    %c0_70 = arith.constant 0 : index
    %c0_71 = arith.constant 0 : index
    %117 = vector.load %arg1[%c0_68, %c5_69, %c0_70, %c0_71] : memref<1x7x2x128xbf16, #tpu.memory_space<vmem>>, vector<1x1x2x128xbf16>
    %118 = vector.shape_cast %117 : vector<1x1x2x128xbf16> to vector<2x128xbf16>
    %119 = arith.extf %118 : vector<2x128xbf16> to vector<2x128xf32>
    %c0_72 = arith.constant 0 : index
    %c6 = arith.constant 6 : index
    %c0_73 = arith.constant 0 : index
    %c0_74 = arith.constant 0 : index
    %120 = vector.load %arg1[%c0_72, %c6, %c0_73, %c0_74] : memref<1x7x2x128xbf16, #tpu.memory_space<vmem>>, vector<1x1x2x128xbf16>
    %121 = vector.shape_cast %120 : vector<1x1x2x128xbf16> to vector<2x128xbf16>
    %122 = arith.extf %121 : vector<2x128xbf16> to vector<2x128xf32>
    %c0_75 = arith.constant 0 : index
    %c0_76 = arith.constant 0 : index
    %c0_77 = arith.constant 0 : index
    %c0_78 = arith.constant 0 : index
    %123 = vector.load %arg7[%c0_75, %c0_76, %c0_77, %c0_78] : memref<1x3x2x128xf32, #tpu.memory_space<vmem>>, vector<1x1x2x128xf32>
    %124 = vector.shape_cast %123 : vector<1x1x2x128xf32> to vector<2x128xf32>
    %125 = vector.shape_cast %116 : vector<2x128xf32> to vector<1x1x2x128xf32>
    tpu.vector_store %arg7[%c0_75, %c0_76, %c0_77, %c0_78], %125 {strides = array<i32>} : memref<1x3x2x128xf32, #tpu.memory_space<vmem>>, vector<1x1x2x128xf32>,
    %c0_79 = arith.constant 0 : index
    %c1_80 = arith.constant 1 : index
    %c0_81 = arith.constant 0 : index
    %c0_82 = arith.constant 0 : index
    %126 = vector.load %arg7[%c0_79, %c1_80, %c0_81, %c0_82] : memref<1x3x2x128xf32, #tpu.memory_space<vmem>>, vector<1x1x2x128xf32>
    %127 = vector.shape_cast %126 : vector<1x1x2x128xf32> to vector<2x128xf32>
    %128 = vector.shape_cast %119 : vector<2x128xf32> to vector<1x1x2x128xf32>
    tpu.vector_store %arg7[%c0_79, %c1_80, %c0_81, %c0_82], %128 {strides = array<i32>} : memref<1x3x2x128xf32, #tpu.memory_space<vmem>>, vector<1x1x2x128xf32>,
    %c0_83 = arith.constant 0 : index
    %c2_84 = arith.constant 2 : index
    %c0_85 = arith.constant 0 : index
    %c0_86 = arith.constant 0 : index
    %129 = vector.load %arg7[%c0_83, %c2_84, %c0_85, %c0_86] : memref<1x3x2x128xf32, #tpu.memory_space<vmem>>, vector<1x1x2x128xf32>
    %130 = vector.shape_cast %129 : vector<1x1x2x128xf32> to vector<2x128xf32>
    %131 = vector.shape_cast %122 : vector<2x128xf32> to vector<1x1x2x128xf32>
    tpu.vector_store %arg7[%c0_83, %c2_84, %c0_85, %c0_86], %131 {strides = array<i32>} : memref<1x3x2x128xf32, #tpu.memory_space<vmem>>, vector<1x1x2x128xf32>,
    %cst_87 = arith.constant 9.99999996E-13 : f32
    %132 = vector.broadcast %cst_87 : f32 to vector<2x128xf32>
    %133 = arith.maximumf %116, %132 : vector<2x128xf32>
    %134 = math.log %133 : vector<2x128xf32>
    %cst_88 = arith.constant 2.200000e+00 : f32
    %135 = vector.broadcast %cst_88 : f32 to vector<2x128xf32>
    %136 = arith.mulf %135, %134 : vector<2x128xf32>
    %137 = math.exp %136 : vector<2x128xf32>
    %cst_89 = arith.constant 9.99999996E-13 : f32
    %138 = vector.broadcast %cst_89 : f32 to vector<2x128xf32>
    %139 = arith.maximumf %119, %138 : vector<2x128xf32>
    %140 = math.log %139 : vector<2x128xf32>
    %cst_90 = arith.constant 2.200000e+00 : f32
    %141 = vector.broadcast %cst_90 : f32 to vector<2x128xf32>
    %142 = arith.mulf %141, %140 : vector<2x128xf32>
    %143 = math.exp %142 : vector<2x128xf32>
    %cst_91 = arith.constant 9.99999996E-13 : f32
    %144 = vector.broadcast %cst_91 : f32 to vector<2x128xf32>
    %145 = arith.maximumf %122, %144 : vector<2x128xf32>
    %146 = math.log %145 : vector<2x128xf32>
    %cst_92 = arith.constant 2.200000e+00 : f32
    %147 = vector.broadcast %cst_92 : f32 to vector<2x128xf32>
    %148 = arith.mulf %147, %146 : vector<2x128xf32>
    %149 = math.exp %148 : vector<2x128xf32>
    %150 = arith.index_cast %arg0 : i32 to index
    %c0_93 = arith.constant 0 : index
    %151 = memref.load %arg2[%150, %c0_93] : memref<2x8xf32, #tpu.memory_space<smem>>
    %152 = arith.index_cast %arg0 : i32 to index
    %c1_94 = arith.constant 1 : index
    %153 = memref.load %arg2[%152, %c1_94] : memref<2x8xf32, #tpu.memory_space<smem>>
    %154 = arith.index_cast %arg0 : i32 to index
    %c2_95 = arith.constant 2 : index
    %155 = memref.load %arg2[%154, %c2_95] : memref<2x8xf32, #tpu.memory_space<smem>>
    %156 = arith.index_cast %arg0 : i32 to index
    %c3_96 = arith.constant 3 : index
    %157 = memref.load %arg2[%156, %c3_96] : memref<2x8xf32, #tpu.memory_space<smem>>
    %158 = arith.index_cast %arg0 : i32 to index
    %c4_97 = arith.constant 4 : index
    %159 = memref.load %arg2[%158, %c4_97] : memref<2x8xf32, #tpu.memory_space<smem>>
    %160 = arith.index_cast %arg0 : i32 to index
    %c5_98 = arith.constant 5 : index
    %161 = memref.load %arg2[%160, %c5_98] : memref<2x8xf32, #tpu.memory_space<smem>>
    %162 = arith.index_cast %arg0 : i32 to index
    %c6_99 = arith.constant 6 : index
    %163 = memref.load %arg2[%162, %c6_99] : memref<2x8xf32, #tpu.memory_space<smem>>
    %164 = vector.broadcast %159 : f32 to vector<2x128xf32>
    %165 = arith.mulf %90, %164 : vector<2x128xf32>
    %166 = vector.broadcast %161 : f32 to vector<2x128xf32>
    %167 = arith.mulf %91, %166 : vector<2x128xf32>
    %168 = arith.addf %165, %167 : vector<2x128xf32>
    %169 = vector.broadcast %163 : f32 to vector<2x128xf32>
    %170 = arith.mulf %92, %169 : vector<2x128xf32>
    %171 = arith.addf %168, %170 : vector<2x128xf32>
    %cst_100 = arith.constant 0.000000e+00 : f32
    %172 = vector.broadcast %cst_100 : f32 to vector<2x128xf32>
    %173 = arith.maximumf %171, %172 : vector<2x128xf32>
    %c0_101 = arith.constant 0 : index
    %c0_102 = arith.constant 0 : index
    %c0_103 = arith.constant 0 : index
    %c0_104 = arith.constant 0 : index
    %174 = vector.load %arg8[%c0_101, %c0_102, %c0_103, %c0_104] : memref<1x1x2x128xf32, #tpu.memory_space<vmem>>, vector<1x1x2x128xf32>
    %175 = vector.shape_cast %174 : vector<1x1x2x128xf32> to vector<2x128xf32>
    %176 = vector.shape_cast %173 : vector<2x128xf32> to vector<1x1x2x128xf32>
    tpu.vector_store %arg8[%c0_101, %c0_102, %c0_103, %c0_104], %176 {strides = array<i32>} : memref<1x1x2x128xf32, #tpu.memory_space<vmem>>, vector<1x1x2x128xf32>,
    %cst_105 = arith.constant 2.000000e+00 : f32
    %177 = vector.broadcast %cst_105 : f32 to vector<2x128xf32>
    %178 = arith.mulf %177, %171 : vector<2x128xf32>
    %179 = arith.mulf %178, %90 : vector<2x128xf32>
    %180 = vector.broadcast %159 : f32 to vector<2x128xf32>
    %181 = arith.subf %179, %180 : vector<2x128xf32>
    %182 = arith.mulf %178, %91 : vector<2x128xf32>
    %183 = vector.broadcast %161 : f32 to vector<2x128xf32>
    %184 = arith.subf %182, %183 : vector<2x128xf32>
    %185 = arith.mulf %178, %92 : vector<2x128xf32>
    %186 = vector.broadcast %163 : f32 to vector<2x128xf32>
    %187 = arith.subf %185, %186 : vector<2x128xf32>
    %188 = arith.mulf %10, %181 : vector<2x128xf32>
    %189 = arith.mulf %12, %184 : vector<2x128xf32>
    %190 = arith.addf %188, %189 : vector<2x128xf32>
    %191 = arith.mulf %14, %187 : vector<2x128xf32>
    %192 = arith.addf %190, %191 : vector<2x128xf32>
    %cst_106 = arith.constant 0.000000e+00 : f32
    %193 = vector.broadcast %cst_106 : f32 to vector<2x128xf32>
    %194 = arith.maximumf %192, %193 : vector<2x128xf32>
    %cst_107 = arith.constant 0.000000e+00 : f32
    %195 = vector.broadcast %cst_107 : f32 to vector<2x128xf32>
    %196 = arith.cmpf ogt, %171, %195 : vector<2x128xf32>
    %197 = arith.extui %196 : vector<2x128xi1> to vector<2x128xi32>
    %198 = arith.sitofp %197 : vector<2x128xi32> to vector<2x128xf32>
    %199 = arith.mulf %194, %198 : vector<2x128xf32>
    %200 = arith.mulf %199, %8 : vector<2x128xf32>
    %cst_108 = arith.constant 9.99999997E-7 : f32
    %cst_109 = arith.constant 0.999998986 : f32
    %201 = vector.broadcast %cst_108 : f32 to vector<2x128xf32>
    %202 = arith.maximumf %201, %200 : vector<2x128xf32>
    %203 = vector.broadcast %cst_109 : f32 to vector<2x128xf32>
    %204 = arith.minimumf %203, %202 : vector<2x128xf32>
    %205 = math.log %204 : vector<2x128xf32>
    %206 = vector.broadcast %151 : f32 to vector<2x128xf32>
    %207 = arith.mulf %206, %205 : vector<2x128xf32>
    %208 = math.exp %207 : vector<2x128xf32>
    %c0_110 = arith.constant 0 : index
    %c0_111 = arith.constant 0 : index
    %c0_112 = arith.constant 0 : index
    %c0_113 = arith.constant 0 : index
    %209 = vector.load %arg9[%c0_110, %c0_111, %c0_112, %c0_113] : memref<1x1x2x128xf32, #tpu.memory_space<vmem>>, vector<1x1x2x128xf32>
    %210 = vector.shape_cast %209 : vector<1x1x2x128xf32> to vector<2x128xf32>
    %211 = vector.shape_cast %208 : vector<2x128xf32> to vector<1x1x2x128xf32>
    tpu.vector_store %arg9[%c0_110, %c0_111, %c0_112, %c0_113], %211 {strides = array<i32>} : memref<1x1x2x128xf32, #tpu.memory_space<vmem>>, vector<1x1x2x128xf32>,
    %212 = vector.broadcast %157 : f32 to vector<2x128xf32>
    %213 = arith.mulf %212, %173 : vector<2x128xf32>
    %214 = vector.broadcast %155 : f32 to vector<2x128xf32>
    %215 = arith.addf %214, %213 : vector<2x128xf32>
    %216 = vector.broadcast %153 : f32 to vector<2x128xf32>
    %217 = arith.mulf %208, %216 : vector<2x128xf32>
    %218 = arith.mulf %137, %215 : vector<2x128xf32>
    %219 = arith.addf %218, %217 : vector<2x128xf32>
    %cst_114 = arith.constant 1.000000e-07 : f32
    %220 = vector.broadcast %cst_114 : f32 to vector<2x128xf32>
    %221 = arith.maximumf %219, %220 : vector<2x128xf32>
    %222 = math.log %221 : vector<2x128xf32>
    %cst_115 = arith.constant 0.454545468 : f32
    %223 = vector.broadcast %cst_115 : f32 to vector<2x128xf32>
    %224 = arith.mulf %223, %222 : vector<2x128xf32>
    %225 = math.exp %224 : vector<2x128xf32>
    %cst_116 = arith.constant 0.000000e+00 : f32
    %cst_117 = arith.constant 1.000000e+00 : f32
    %226 = vector.broadcast %cst_116 : f32 to vector<2x128xf32>
    %227 = arith.maximumf %226, %225 : vector<2x128xf32>
    %228 = vector.broadcast %cst_117 : f32 to vector<2x128xf32>
    %229 = arith.minimumf %228, %227 : vector<2x128xf32>
    %c0_118 = arith.constant 0 : index
    %c0_119 = arith.constant 0 : index
    %c0_120 = arith.constant 0 : index
    %c0_121 = arith.constant 0 : index
    %230 = vector.load %arg10[%c0_118, %c0_119, %c0_120, %c0_121] : memref<1x3x2x128xf32, #tpu.memory_space<vmem>>, vector<1x1x2x128xf32>
    %231 = vector.shape_cast %230 : vector<1x1x2x128xf32> to vector<2x128xf32>
    %232 = vector.shape_cast %229 : vector<2x128xf32> to vector<1x1x2x128xf32>
    tpu.vector_store %arg10[%c0_118, %c0_119, %c0_120, %c0_121], %232 {strides = array<i32>} : memref<1x3x2x128xf32, #tpu.memory_space<vmem>>, vector<1x1x2x128xf32>,
    %233 = arith.mulf %143, %215 : vector<2x128xf32>
    %234 = arith.addf %233, %217 : vector<2x128xf32>
    %cst_122 = arith.constant 1.000000e-07 : f32
    %235 = vector.broadcast %cst_122 : f32 to vector<2x128xf32>
    %236 = arith.maximumf %234, %235 : vector<2x128xf32>
    %237 = math.log %236 : vector<2x128xf32>
    %cst_123 = arith.constant 0.454545468 : f32
    %238 = vector.broadcast %cst_123 : f32 to vector<2x128xf32>
    %239 = arith.mulf %238, %237 : vector<2x128xf32>
    %240 = math.exp %239 : vector<2x128xf32>
    %cst_124 = arith.constant 0.000000e+00 : f32
    %cst_125 = arith.constant 1.000000e+00 : f32
    %241 = vector.broadcast %cst_124 : f32 to vector<2x128xf32>
    %242 = arith.maximumf %241, %240 : vector<2x128xf32>
    %243 = vector.broadcast %cst_125 : f32 to vector<2x128xf32>
    %244 = arith.minimumf %243, %242 : vector<2x128xf32>
    %c0_126 = arith.constant 0 : index
    %c1_127 = arith.constant 1 : index
    %c0_128 = arith.constant 0 : index
    %c0_129 = arith.constant 0 : index
    %245 = vector.load %arg10[%c0_126, %c1_127, %c0_128, %c0_129] : memref<1x3x2x128xf32, #tpu.memory_space<vmem>>, vector<1x1x2x128xf32>
    %246 = vector.shape_cast %245 : vector<1x1x2x128xf32> to vector<2x128xf32>
    %247 = vector.shape_cast %244 : vector<2x128xf32> to vector<1x1x2x128xf32>
    tpu.vector_store %arg10[%c0_126, %c1_127, %c0_128, %c0_129], %247 {strides = array<i32>} : memref<1x3x2x128xf32, #tpu.memory_space<vmem>>, vector<1x1x2x128xf32>,
    %248 = arith.mulf %149, %215 : vector<2x128xf32>
    %249 = arith.addf %248, %217 : vector<2x128xf32>
    %cst_130 = arith.constant 1.000000e-07 : f32
    %250 = vector.broadcast %cst_130 : f32 to vector<2x128xf32>
    %251 = arith.maximumf %249, %250 : vector<2x128xf32>
    %252 = math.log %251 : vector<2x128xf32>
    %cst_131 = arith.constant 0.454545468 : f32
    %253 = vector.broadcast %cst_131 : f32 to vector<2x128xf32>
    %254 = arith.mulf %253, %252 : vector<2x128xf32>
    %255 = math.exp %254 : vector<2x128xf32>
    %cst_132 = arith.constant 0.000000e+00 : f32
    %cst_133 = arith.constant 1.000000e+00 : f32
    %256 = vector.broadcast %cst_132 : f32 to vector<2x128xf32>
    %257 = arith.maximumf %256, %255 : vector<2x128xf32>
    %258 = vector.broadcast %cst_133 : f32 to vector<2x128xf32>
    %259 = arith.minimumf %258, %257 : vector<2x128xf32>
    %c0_134 = arith.constant 0 : index
    %c2_135 = arith.constant 2 : index
    %c0_136 = arith.constant 0 : index
    %c0_137 = arith.constant 0 : index
    %260 = vector.load %arg10[%c0_134, %c2_135, %c0_136, %c0_137] : memref<1x3x2x128xf32, #tpu.memory_space<vmem>>, vector<1x1x2x128xf32>
    %261 = vector.shape_cast %260 : vector<1x1x2x128xf32> to vector<2x128xf32>
    %262 = vector.shape_cast %259 : vector<2x128xf32> to vector<1x1x2x128xf32>
    tpu.vector_store %arg10[%c0_134, %c2_135, %c0_136, %c0_137], %262 {strides = array<i32>} : memref<1x3x2x128xf32, #tpu.memory_space<vmem>>, vector<1x1x2x128xf32>,
    return
  }
  func.func @transform_0(%arg0: i32) -> (i32, i32, i32, i32) {
    %c0_i32 = arith.constant 0 : i32
    %c0_i32_0 = arith.constant 0 : i32
    %c0_i32_1 = arith.constant 0 : i32
    %c0_i32_2 = arith.constant 0 : i32
    return %arg0, %c0_i32, %c0_i32_0, %c0_i32_1 : i32, i32, i32, i32
  }
  func.func @transform_1(%arg0: i32) -> (i32, i32) {
    %c0_i32 = arith.constant 0 : i32
    %c0_i32_0 = arith.constant 0 : i32
    %c0_i32_1 = arith.constant 0 : i32
    return %c0_i32, %c0_i32_0 : i32, i32
  }
  func.func @transform_2(%arg0: i32) -> i32 {
    %c0_i32 = arith.constant 0 : i32
    %c0_i32_0 = arith.constant 0 : i32
    return %c0_i32 : i32
  }
  func.func @transform_3(%arg0: i32) -> (i32, i32, i32) {
    %c0_i32 = arith.constant 0 : i32
    %c0_i32_0 = arith.constant 0 : i32
    %c0_i32_1 = arith.constant 0 : i32
    %c0_i32_2 = arith.constant 0 : i32
    return %c0_i32, %c0_i32_0, %c0_i32_1 : i32, i32, i32
  }
  func.func @transform_4(%arg0: i32) -> (i32, i32, i32, i32) {
    %c0_i32 = arith.constant 0 : i32
    %c0_i32_0 = arith.constant 0 : i32
    %c0_i32_1 = arith.constant 0 : i32
    %c0_i32_2 = arith.constant 0 : i32
    return %arg0, %c0_i32, %c0_i32_0, %c0_i32_1 : i32, i32, i32, i32
  }
  func.func @transform_5(%arg0: i32) -> (i32, i32, i32, i32) {
    %c0_i32 = arith.constant 0 : i32
    %c0_i32_0 = arith.constant 0 : i32
    %c0_i32_1 = arith.constant 0 : i32
    %c0_i32_2 = arith.constant 0 : i32
    return %arg0, %c0_i32, %c0_i32_0, %c0_i32_1 : i32, i32, i32, i32
  }
  func.func @transform_6(%arg0: i32) -> (i32, i32, i32, i32) {
    %c0_i32 = arith.constant 0 : i32
    %c0_i32_0 = arith.constant 0 : i32
    %c0_i32_1 = arith.constant 0 : i32
    %c0_i32_2 = arith.constant 0 : i32
    return %arg0, %c0_i32, %c0_i32_0, %c0_i32_1 : i32, i32, i32, i32
  }
  func.func @transform_7(%arg0: i32) -> (i32, i32, i32, i32) {
    %c0_i32 = arith.constant 0 : i32
    %c0_i32_0 = arith.constant 0 : i32
    %c0_i32_1 = arith.constant 0 : i32
    %c0_i32_2 = arith.constant 0 : i32
    return %arg0, %c0_i32, %c0_i32_0, %c0_i32_1 : i32, i32, i32, i32
  }
  func.func @transform_8(%arg0: i32) -> (i32, i32, i32, i32) {
    %c0_i32 = arith.constant 0 : i32
    %c0_i32_0 = arith.constant 0 : i32
    %c0_i32_1 = arith.constant 0 : i32
    %c0_i32_2 = arith.constant 0 : i32
    return %arg0, %c0_i32, %c0_i32_0, %c0_i32_1 : i32, i32, i32, i32
  }
  func.func @transform_9(%arg0: i32) -> (i32, i32, i32, i32) {
    %c0_i32 = arith.constant 0 : i32
    %c0_i32_0 = arith.constant 0 : i32
    %c0_i32_1 = arith.constant 0 : i32
    %c0_i32_2 = arith.constant 0 : i32
    return %arg0, %c0_i32, %c0_i32_0, %c0_i32_1 : i32, i32, i32, i32
  }
}

</mosaic_0001>

<bundles_post_ra>
// kernel: derender_forward.2
= control target key start
LH: loop header
LB: loop body
LE: loop exit
PB: predicated region body
PF: predicated region fallthrough
CT: control target
= control target key end

     0   :  { %s919_s21 = smov 0   ;;  %s921_s22 = smov 0   ;;  %s1025_s0 = inlined_call_operand.vmem [shape: f32[2,3,256], index: 0, kind: input, shape index: {}]   ;;  %s1026_s1 = inlined_call_operand.vmem [shape: f32[64,3], index: 1, kind: input, shape index: {}]   ;;  %s1027_s2 = inlined_call_operand.vmem [shape: f32[64,1], index: 2, kind: input, shape index: {}]   ;;  %s1028_s3 = inlined_call_operand.vmem [shape: f32[7,64], index: 3, kind: input, shape index: {}]   ;;  %s1029_s4 = inlined_call_operand.vmem [shape: f32[7,1], index: 4, kind: input, shape index: {}]   ;;  %s1030_s5 = inlined_call_operand.vmem [shape: bf16[2,7,256], index: 5, kind: output, shape index: {0}]   ;;  %s1031_s6 = inlined_call_operand.vmem [shape: f32[2,1,2,128], index: 6, kind: output, shape index: {1}]  }
   0x1   :  { %s923_s23 = smov 0  }
   0x2 LB: > { %s29_s24 = sadd.s32 1, %s876_s22  ;;  %p786_p0 = scmp.ge.s32.totalorder %s880_s23, 1  ;;  %s880_s23 = sphi %s923_s23, %s17_s23   ;;  %s876_s22 = sphi %s921_s22, %s1033_s22   ;;  %s872_s21 = sphi %s919_s21, %s1032_s21  }
   0x3   : > { %p31_p1 = scmp.ge.s32.totalorder %s29_s24, 2  ;;  %p238_p2 = scmp.lt.s32.totalorder %s880_s23, 3 }
   0x5   : > { %s1035_s24 = smov (%p31_p1, %s29_s24), 0  ;;  %p239_p3 = pnand %p786_p0, %p238_p2 }
   0x6   : > { %p284_p4 = scmp.lt.s32.totalorder (!%p239_p3), %s872_s21, 1  ;;  %v882_v0 = vmov (!%p239_p3), 0.0   ;;  %v883_v1 = vmov (!%p239_p3), 0   ;;  %v319_v2 = vld [vmem:[%s1027_s2] sm:$0xff] (!%p239_p3)  ;;  %v321_v3 = vld [vmem:[%s1027_s2 + $0x10] sm:$0xff] (!%p239_p3)  ;;  %v320_v4 = vld [vmem:[%s1027_s2 + $0x8] sm:$0xff] (!%p239_p3) }
   0x7   : > { %242 = sbr.rel (%p239_p3) target bundleno = 654 (0x28e), region = 40  ;;  %463 = vmatprep.mubr.f32.mxu0 (!%p239_p3), %v882_v0  ;;  %603 = vmatprep.mubr.f32.mxu1 (!%p239_p3), %v882_v0  ;;  %v322_v5 = vld [vmem:[%s1027_s2 + $0x18] sm:$0xff] (!%p239_p3)  ;;  %vm394_vm0 = vcmask (!%p239_p3), 1042432   ;;  %v311_v8 = vld [vmem:[%s1026_s1] sm:$0xff] (!%p239_p3)  ;;  %vm369_vm1 = vcmask (!%p239_p3), 23552   ;;  %v324_v10 = vld [vmem:[%s1027_s2 + $0x28] sm:$0xff] (!%p239_p3) }
   0x8   : > { %851 = vset.pattern.permute.xlu0 (!%p239_p3), %v883_v1  ;;  %852 = vset.pattern.permute.xlu1 (!%p239_p3), %v883_v1  ;;  %v323_v9 = vld [vmem:[%s1027_s2 + $0x20] sm:$0xff] (!%p239_p3)  ;;  %v312_v11 = vld [vmem:[%s1026_s1 + $0x8] sm:$0xff] (!%p239_p3)  ;;  %v325_v12 = vld [vmem:[%s1027_s2 + $0x30] sm:$0xff] (!%p239_p3)  ;;  %vm535_vm2 = vcmask (!%p239_p3), 523264   ;;  %vm629_vm3 = vcmask (!%p239_p3), 1043456   ;;  %vm632_vm5 = vcmask (!%p239_p3), 1047556  }
   0x9   : > { %329 = vperm.xlu0 (!%p239_p3), %851, %v319_v2   ;;  %339 = vperm.xlu1 (!%p239_p3), %852, %v321_v3   ;;  %v326_v13 = vld [vmem:[%s1027_s2 + $0x38] sm:$0xff] (!%p239_p3)  ;;  %v313_v14 = vld [vmem:[%s1026_s1 + $0x10] sm:$0xff] (!%p239_p3)  ;;  %v529_v15 = vld [vmem:[%s1029_s4] sm:$0x7f] (!%p239_p3)  ;;  %vm630_vm4 = vsmask.f32 (!%p239_p3), 3328 }
   0xa   : > { %v314_v16 = vld [vmem:[%s1026_s1 + $0x18] sm:$0xff] (!%p239_p3)  ;;  %v315_v17 = vld [vmem:[%s1026_s1 + $0x20] sm:$0xff] (!%p239_p3)  ;;  %v316_v18 = vld [vmem:[%s1026_s1 + $0x28] sm:$0xff] (!%p239_p3)  ;;  %vm633_vm6 = vsmask.f32 (!%p239_p3), 7424  ;;  %vm641_vm11 = vcmask (!%p239_p3), 1040384  }
   0xb   : > { %v317_v19 = vld [vmem:[%s1026_s1 + $0x30] sm:$0xff] (!%p239_p3)  ;;  %v318_v20 = vld [vmem:[%s1026_s1 + $0x38] sm:$0xff] (!%p239_p3)  ;;  %vm631_vm8 = vmand (!%p239_p3), %vm629_vm3, %vm630_vm4 }
   0xc   : > { %vm634_vm9 = vmand (!%p239_p3), %vm632_vm5, %vm633_vm6 }
   0xd   : > { %334 = vperm.xlu0 (!%p239_p3), %851, %v320_v4   ;;  %344 = vperm.xlu1 (!%p239_p3), %852, %v322_v5   ;;  %vm635_vm10 = vmor (!%p239_p3), %vm634_vm9, %vm631_vm8 }
   0xe   : > { %s1037_s21 = smov (!%p284_p4, %s872_s21), 1 }
   0xf   : > { %s806_s29 = sshll.u32 %s1037_s21, 3 }
  0x10   : > { %s291_s8 = scalar_lea.vmem %s1025_s0, %s806_s29  ;;  %s301_s28 = scalar_lea.vmem %s1030_s5, %s806_s29 }
  0x11   : > { %v310_v6 = vld [vmem:[%s291_s8] sm:$0x77]  ;;  %349 = vperm.xlu0 %851, %v323_v9   ;;  %354 = vperm.xlu1 %852, %v324_v10   ;;  %s791_s29 = sshll.u32 %s1037_s21, 1 }
  0x12   : > { %v368_v7 = vcombine.high %v310_v6, %v310_v6  ;;  %s309_s8 = scalar_lea.vmem %s1031_s6, %s791_s29 }
  0x14   : > { %792 = vmatprep.subr.msk.mxu0 %vm394_vm0, %v368_v7 }
  0x15   : > { %793 = vmatpush1.msk.msra.mxu0 %vm394_vm0, %v310_v6  ;;  %359 = vperm.xlu0 %851, %v325_v12  }
  0x16   : > { %794 = vmatmul.mubr.msk.f32.vlgmr.msra.gmra.mrb[0].mxu0 %vm369_vm1, %v311_v8  ;;  %364 = vperm.xlu1 %852, %v326_v13  }
  0x17   : > { %469 = vmatprep.mubr.f32.mxu0 %v882_v0 }
  0x19   : > { %532 = vperm.xlu0 %851, %v529_v15  }
  0x1a   : > { %795 = vmatmul.mubr.msk.f32.gmra.mrb[2].mxu0 %vm369_vm1, %v312_v11 }
  0x1b   : > { %475 = vmatprep.mubr.f32.mxu0 %v882_v0 }
  0x1e   : > { %796 = vmatmul.mubr.msk.f32.gmra.mrb[4].mxu0 %vm369_vm1, %v313_v14 }
  0x1f   : > { %481 = vmatprep.mubr.f32.mxu0 %v882_v0 }
  0x22   : > { %797 = vmatmul.mubr.msk.f32.gmra.mrb[6].mxu0 %vm369_vm1, %v314_v16 }
  0x23   : > { %487 = vmatprep.mubr.f32.mxu0 %v882_v0 }
  0x26   : > { %798 = vmatmul.mubr.msk.f32.gmra.mrb[8].mxu0 %vm369_vm1, %v315_v17 }
  0x27   : > { %493 = vmatprep.mubr.f32.mxu0 %v882_v0 }
  0x2a   : > { %799 = vmatmul.mubr.msk.f32.gmra.mrb[10].mxu0 %vm369_vm1, %v316_v18 }
  0x2b   : > { %499 = vmatprep.mubr.f32.mxu0 %v882_v0 }
  0x2e   : > { %800 = vmatmul.mubr.msk.f32.gmra.mrb[12].mxu0 %vm369_vm1, %v317_v19 }
  0x2f   : > { %505 = vmatprep.mubr.f32.mxu0 %v882_v0 }
  0x32   : > { %801 = vmatmul.mubr.msk.f32.gmra.mrb[14].mxu0 %vm369_vm1, %v318_v20 }
  0x88   : > { %v330_v21 = vpop.permute.xlu0 %329  ;;  %v340_v30 = vpop.permute.xlu1 %339 }
  0x8c   : > { %v335_v25 = vpop.permute.xlu0 %334  ;;  %v345_v41 = vpop.permute.xlu1 %344 }
  0x90   : > { %v350_v54 = vpop.permute.xlu0 %349  ;;  %v355_v57 = vpop.permute.xlu1 %354 }
  0x94   : > { %v360_v6 = vpop.permute.xlu0 %359 }
  0x95   : > { %v365_v9 = vpop.permute.xlu1 %364 }
  0xe9   : > { %v465_v22 = vpop.f32.mrb[0].mxu0 }
  0xea   : > { %v467_v23 = vpop.f32.mrb[1].mxu0  ;;  %v466_v24 = vadd.f32 %v465_v22, %v330_v21  ;;  %v533_v22 = vpop.permute.xlu0 %532 }
  0xeb   : > { %v468_v26 = vadd.f32 %v467_v23, %v330_v21  ;;  %v528_v21 = vld [vmem:[%s1028_s3] sm:$0x7f] }
  0xec   : > { %v512_v32 = vmax.f32 %v466_v24, 0.0 }
  0xed   : > { %v471_v27 = vpop.f32.mrb[2].mxu0  ;;  %v513_v34 = vmax.f32 %v468_v26, 0.0 }
  0xee   : > { %v472_v28 = vadd.f32 %v471_v27, %v335_v25  ;;  %v473_v29 = vpop.f32.mrb[3].mxu0  ;;  %v610_v27 = vlaneseq }
  0xef   : > { %v474_v31 = vadd.f32 %v473_v29, %v335_v25 }
  0xf0   : > { %v514_v33 = vmax.f32 %v472_v28, 0.0  ;;  %v611_v28 = vshrl.u32 %v610_v27, 7 }
  0xf1   : > { %v515_v35 = vmax.f32 %v474_v31, 0.0  ;;  %v477_v36 = vpop.f32.mrb[4].mxu0 }
  0xf2   : > { %v479_v37 = vpop.f32.mrb[5].mxu0  ;;  %v811_v38 = vpack.c.bf16 %v514_v33, %v512_v32  ;;  %v478_v40 = vadd.f32 %v477_v36, %v340_v30  ;;  %vm612_vm7 = vcmp.ge.s32.totalorder %v611_v28, 4  ;;  %v636_v36 = vld [vmem:[%s301_s28] sm:$0xff] }
  0xf3   : > { %v809_v39 = vpack.c.bf16 %v515_v35, %v513_v34  ;;  %v480_v42 = vadd.f32 %v479_v37, %v340_v30 }
  0xf4   : > { %v516_v47 = vmax.f32 %v478_v40, 0.0 }
  0xf5   : > { %v483_v43 = vpop.f32.mrb[6].mxu0  ;;  %810 = vmatprep.subr.bf16.mxu1 %v809_v39  ;;  %v517_v49 = vmax.f32 %v480_v42, 0.0 }
  0xf6   : > { %v484_v44 = vadd.f32 %v483_v43, %v345_v41  ;;  %v485_v45 = vpop.f32.mrb[7].mxu0  ;;  %812 = vmatpush1.bf16.msra.mxu1 %v811_v38 }
  0xf7   : > { %v486_v46 = vadd.f32 %v485_v45, %v345_v41 }
  0xf8   : > { %v518_v48 = vmax.f32 %v484_v44, 0.0 }
  0xf9   : > { %v519_v50 = vmax.f32 %v486_v46, 0.0  ;;  %v489_v51 = vpop.f32.mrb[8].mxu0 }
  0xfa   : > { %v815_v52 = vpack.c.bf16 %v518_v48, %v516_v47  ;;  %v491_v53 = vpop.f32.mrb[9].mxu0  ;;  %v490_v56 = vadd.f32 %v489_v51, %v350_v54 }
  0xfb   : > { %v813_v55 = vpack.c.bf16 %v519_v50, %v517_v49  ;;  %v492_v58 = vadd.f32 %v491_v53, %v350_v54 }
  0xfc   : > { %v520_v63 = vmax.f32 %v490_v56, 0.0 }
  0xfd   : > { %v495_v59 = vpop.f32.mrb[10].mxu0  ;;  %814 = vmatprep.subr.bf16.mxu1 %v813_v55  ;;  %v521_v1 = vmax.f32 %v492_v58, 0.0 }
  0xfe   : > { %v496_v60 = vadd.f32 %v495_v59, %v355_v57  ;;  %v497_v61 = vpop.f32.mrb[11].mxu0  ;;  %816 = vmatpush1.bf16.msra.mxu1 %v815_v52 }
  0xff   : > { %v498_v62 = vadd.f32 %v497_v61, %v355_v57 }
 0x100   : > { %v522_v0 = vmax.f32 %v496_v60, 0.0 }
 0x101   : > { %v523_v2 = vmax.f32 %v498_v62, 0.0  ;;  %v501_v3 = vpop.f32.mrb[12].mxu0 }
 0x102   : > { %v819_v4 = vpack.c.bf16 %v522_v0, %v520_v63  ;;  %v503_v5 = vpop.f32.mrb[13].mxu0  ;;  %v502_v8 = vadd.f32 %v501_v3, %v360_v6 }
 0x103   : > { %v817_v7 = vpack.c.bf16 %v523_v2, %v521_v1  ;;  %v504_v10 = vadd.f32 %v503_v5, %v360_v6 }
 0x104   : > { %v524_v15 = vmax.f32 %v502_v8, 0.0 }
 0x105   : > { %v507_v11 = vpop.f32.mrb[14].mxu0  ;;  %818 = vmatprep.subr.bf16.mxu1 %v817_v7  ;;  %v525_v17 = vmax.f32 %v504_v10, 0.0 }
 0x106   : > { %v508_v12 = vadd.f32 %v507_v11, %v365_v9  ;;  %v509_v13 = vpop.f32.mrb[15].mxu0  ;;  %820 = vmatpush1.bf16.msra.mxu1 %v819_v4 }
 0x107   : > { %v510_v14 = vadd.f32 %v509_v13, %v365_v9 }
 0x108   : > { %v526_v16 = vmax.f32 %v508_v12, 0.0 }
 0x109   : > { %v527_v18 = vmax.f32 %v510_v14, 0.0 }
 0x10a   : > { %v823_v19 = vpack.c.bf16 %v526_v16, %v524_v15 }
 0x10b   : > { %v821_v20 = vpack.c.bf16 %v527_v18, %v525_v17 }
 0x10d   : > { %822 = vmatprep.subr.bf16.mxu1 %v821_v20 }
 0x10e   : > { %824 = vmatpush1.bf16.msra.mxu1 %v823_v19 }
 0x111   : > { %802 = vmatmul.mubr.msk.f32.vlgmr.msra.gmra.mrb[0].mxu1 %vm535_vm2, %v528_v21 }
 0x1e4   : > { %v605_v23 = vpop.f32.mrb[0].mxu1 }
 0x1e5   : > { %v606_v24 = vadd.f32 %v605_v23, %v533_v22  ;;  %v607_v25 = vpop.f32.mrb[1].mxu1 }
 0x1e6   : > { %v608_v26 = vadd.f32 %v607_v25, %v533_v22 }
 0x1e7   : > { %854 = vtanh.f32 %v606_v24 }
 0x1e8   : > { %856 = vtanh.f32 %v608_v26 }
 0x1f1   : > { %v855_v29 = vpop.eup %854 }
 0x1f2   : > { %v857_v30 = vpop.eup %856  ;;  %v615_v31 = vadd.f32 1.0, %v855_v29 }
 0x1f3   : > { %v616_v32 = vadd.f32 1.0, %v857_v30 }
 0x1f4   : > { %v617_v33 = vmul.f32 0.5, %v615_v31 }
 0x1f5   : > { %v618_v34 = vmul.f32 0.5, %v616_v32 }
 0x1f6   : > { %v619_v35 = vsel %vm612_vm7, %v617_v33, %v606_v24 }
 0x1f7   : > { %v620_v37 = vsel %vm612_vm7, %v618_v34, %v608_v26  ;;  %v621_v38 = vpack.c.bf16 %v619_v35, %v619_v35 }
 0x1f8   : > { %v808_v39 = vpack.c.bf16 %v620_v37, %v619_v35  ;;  %v622_v40 = vpack.c.bf16 %v620_v37, %v620_v37 }
 0x1f9   : > { %v639_v41 = vunpack.c.l.bf16 %v621_v38 }
 0x1fa   : > { %v637_v42 = vsel %vm635_vm10, %v808_v39, %v636_v36  ;;  %v640_v43 = vunpack.c.l.bf16 %v622_v40 }
 0x1fb   : > { %638 = vst [vmem:[%s301_s28] sm:$0xff] %v637_v42  ;;  %v647_v44 = vsel %vm641_vm11, %v639_v41, -inf  ;;  %v642_v45 = vsel %vm641_vm11, %v639_v41, inf }
 0x1fc   : > { %v648_v46 = vsel %vm641_vm11, %v640_v43, -inf  ;;  %v643_v47 = vsel %vm641_vm11, %v640_v43, inf }
 0x1fd   : > { %v649_v48 = vmax.f32 %v647_v44, %v648_v46  ;;  %v644_v49 = vmin.f32 %v642_v45, %v643_v47 }
 0x1ff   : > { %650 = vmax.xlane.f32.xlu0 %v649_v48  ;;  %645 = vmin.xlane.f32.xlu1 %v644_v49 }
 0x28c   : > { %v651_v50 = vpop.xlane.xlu0 %650  ;;  %v646_v51 = vpop.xlane.xlu1 %645 }
 0x28d   : > { %653 = vst [vmem:[%s309_s8 + $0x1] sm:$0x1] %v651_v50  ;;  %652 = vst [vmem:[%s309_s8] sm:$0x1] %v646_v51 }
 0x28e PF: > { %s17_s23 = sadd.s32 1, %s880_s23   ;;  %s1032_s21 = smov %s876_s22 }
 0x28f   : > { %p14_p5 = scmp.ge.s32.totalorder %s17_s23, 4   ;;  %s1033_s22 = smov %s1035_s24 }
 0x291   :  { %16 = sbr.rel (!%p14_p5) target bundleno = 2 (0x2), region = 82 }

// kernel: derender_forward.3
= control target key start
LH: loop header
LB: loop body
LE: loop exit
PB: predicated region body
PF: predicated region fallthrough
CT: control target
= control target key end

     0   :  { %15 = vsyncpa [#allocation3], 0  ;;  %s1217_s0 = inlined_call_operand.vmem [shape: bf16[2,7,2,128], index: 0, kind: input, shape index: {}]   ;;  %s1218_s1 = inlined_call_operand.vmem [shape: f32[2,8], index: 1, kind: input, shape index: {}]   ;;  %s1219_s2 = inlined_call_operand.vmem [shape: f32[2], index: 2, kind: input, shape index: {}]   ;;  %s1220_s3 = inlined_call_operand.vmem [shape: f32[6,2,128], index: 3, kind: input, shape index: {}]   ;;  %s1221_s4 = inlined_call_operand.vmem [shape: f32[2,1,2,128], index: 4, kind: output, shape index: {0}]   ;;  %s1222_s5 = inlined_call_operand.vmem [shape: f32[2,3,2,128], index: 5, kind: output, shape index: {1}]   ;;  %s1223_s6 = inlined_call_operand.vmem [shape: f32[2,3,2,128], index: 6, kind: output, shape index: {2}]   ;;  %s1224_s7 = inlined_call_operand.vmem [shape: f32[2,1,2,128], index: 7, kind: output, shape index: {3}]   ;;  %s1225_s8 = inlined_call_operand.vmem [shape: f32[2,1,2,128], index: 8, kind: output, shape index: {4}]   ;;  %s1226_s9 = inlined_call_operand.vmem [shape: f32[2,3,2,128], index: 9, kind: output, shape index: {5}]  }
   0x1   :  { %16 = vsyncpa [#allocation5], 0  ;;  %s1079_s30 = smov 0  }
   0x2 LB: > { %s1085_s10 = sadd.s32 4294967295, %s1022_s30   ;;  %p875_p0 = scmp.ge.s32.totalorder %s1022_s30, 1  ;;  %s1022_s30 = sphi %s1079_s30, %s22_s30  }
   0x3   : > { %p272_p1 = scmp.lt.s32.totalorder %s1022_s30, 3  ;;  %s285_s13 = sshll.u32 %s1218_s1, 4  ;;  %s286_s13 = int_to_ptr.vmem [resolvable:$true] %s285_s13 }
   0x4   : > { %p1227_p3 = scmp.eq.s32.totalorder %s1085_s10, 0  ;;  %s296_s17 = sshll.u32 %s1219_s2, 4  ;;  %s297_s17 = int_to_ptr.vmem [resolvable:$true] %s296_s17 }
   0x5   : > { %p1092_p2 = pnand %p875_p0, %p272_p1  ;;  %s978_s19 = scalar_lea.vmem %s286_s13, 32 }
   0x6   : > { %p979_p6 = scmp.ne.s32.totalorder %s286_s13, %s978_s19  ;;  %p986_p10 = scmp.lt.s32.totalorder %s286_s13, %s286_s13 }
   0x7   : > { %s1229_s14 = scalar_select %p1092_p2, 1, 0 }
   0x8   : > { %p920_p4 = pneg %p1092_p2  ;;  %p987_p11 = scmp.lt.s32.totalorder %s978_s19, %s978_s19 }
   0xa   : > { %p1104_p5 = pnand %p1227_p3, %p920_p4  ;;  %p988_p12 = por %p987_p11, %p986_p10 }
   0xc   : > { %p980_p7 = pneg %p1104_p5 }
   0xe   : > { %p981_p8 = pnand %p980_p7, %p979_p6 }
  0x10   : > { %p982_p9 = pneg %p981_p8 }
  0x12   : > { %p989_p13 = pnand %p988_p12, %p982_p9 }
  0x14   : > { %992 = shalt.err (!%p989_p13)
}
  0x15   : > { %s1024_s20 = smov [#allocation2]   ;;  %s993_s21 = scalar_lea.vmem %s297_s17, 16 }
  0x16   : > { %923 = dma.vmem_to_smem (!%p1104_p5), %s286_s13, 32, %s1024_s20, [#allocation3]  }
  0x17   : > { %p994_p0 = scmp.ne.s32.totalorder %s297_s17, %s993_s21  ;;  %p1001_p3 = scmp.lt.s32.totalorder %s297_s17, %s297_s17 }
  0x18   : > { %p1002_p2 = scmp.lt.s32.totalorder %s993_s21, %s993_s21 }
  0x19   : > { %p996_p1 = pnand %p994_p0, %p980_p7 }
  0x1a   : > { %p1003_p6 = por %p1002_p2, %p1001_p3 }
  0x1b   : > { %p997_p4 = pneg %p996_p1 }
  0x1d   : > { %p1004_p8 = pnand %p1003_p6, %p997_p4 }
  0x1f   : > { %1007 = shalt.err (!%p1004_p8)
}
  0x20   : > { %s1025_s22 = smov [#allocation4]   ;;  %p1231_p9 = scmp.ne.s32.totalorder %s1229_s14, 0 }
  0x21   : > { %926 = dma.vmem_to_smem (!%p1104_p5), %s297_s17, 16, %s1025_s22, [#allocation5]  }
  0x22   : > { %319 = sbr.rel (%p1231_p9) target bundleno = 332 (0x14c), region = 36  ;;  %p1232_p10 = scmp.eq.s32.totalorder (!%p1231_p9), %s1085_s10, 0 }
  0x29   : > { %1013 = dma.done.wait (%p1232_p10), [#allocation3], 32   ;;  %p1233_p11 = pmov %p1232_p10 }
  0x2a   : > { %p1234_p7 = pmov %p1232_p10 }
  0x2b   : > { %1015 = vsyncadd (%p1233_p11), [#allocation3], 4294967264 }
  0x2c   : > { %1017 = dma.done.wait (%p1234_p7), [#allocation5], 16   ;;  %p1235_p2 = pmov %p1234_p7 }
  0x2e   : > { %1019 = vsyncadd (%p1235_p2), [#allocation5], 4294967280 }
  0x2f   : > { %329 = sfence }
  0x30   : > { %p381_p3 = scmp.lt.s32.totalorder %s1085_s10, 1  ;;  %vm458_vm0 = vcmask 1047554   ;;  %s1026_s28 = smov 112   ;;  %v414_v22 = vlaneseq  ;;  %v889_v41 = vld [vmem:[%s1220_s3 + $0x2] sm:$0x3] }
  0x31   : > { %s1027_s29 = smov 127   ;;  %s412_s15 = sld [smem:[#allocation4]]  ;;  %v416_v42 = vld [vmem:[%s1220_s3] sm:$0x3] }
  0x32   : > { %s1126_s23 = scalar_select %p381_p3, %s1085_s10, 1  ;;  %v415_v28 = vand.u32 127, %v414_v22 }
  0x33   : > { %s888_s16 = sld [smem:[#allocation4 + $0x1]]  ;;  %s1162_s25 = sshll.u32 %s1085_s10, 7 }
  0x34   : > { %s910_s24 = smul.u32 7, %s1126_s23  ;;  %s1146_s17 = sshll.u32 %s1126_s23, 1  ;;  %vm474_vm1 = vcmp.lt.s32.totalorder %v415_v28, 112  ;;  %vm468_vm2 = vcmp.lt.s32.totalorder %v415_v28, 127 }
  0x35   : > { %s1136_s11 = smul.u32 6, %s1126_s23  ;;  %s388_s20 = scalar_lea.vmem %s1221_s4, %s1146_s17 }
  0x36   : > { %s1132_s27 = scalar_lea.vmem %s1217_s0, %s910_s24  ;;  %s553_s26 = sadd.s32 4, %s1162_s25 }
  0x37   : > { %v427_v0 = vld [vmem:[%s1132_s27] sm:$0x1]  ;;  %s398_s14 = scalar_lea.vmem %s1223_s6, %s1136_s11  ;;  %v899_v7 = vld [vmem:[%s1132_s27 + $0x4] sm:$0x1]  ;;  %v900_v8 = vld [vmem:[%s1132_s27 + $0x5] sm:$0x1]  ;;  %v431_v15 = vstv %s412_s15  ;;  %s402_s23 = scalar_lea.vmem %s1224_s7, %s1146_s17 }
  0x38   : > { %v428_v1 = vunpack.c.l.bf16 %v427_v0  ;;  %v515_v10 = vunpack.c.l.bf16 %v899_v7  ;;  %v518_v11 = vunpack.c.l.bf16 %v900_v8  ;;  %v901_v12 = vld [vmem:[%s1132_s27 + $0x6] sm:$0x1]  ;;  %v894_v20 = vld [vmem:[%s1132_s27 + $0x1] sm:$0x1]  ;;  %v895_v21 = vld [vmem:[%s1132_s27 + $0x2] sm:$0x1]  ;;  %s411_s21 = scalar_lea.vmem %s1226_s9, %s1136_s11 }
  0x39   : > { %v521_v14 = vunpack.c.l.bf16 %v901_v12  ;;  %v433_v16 = vstv %s888_s16  ;;  %v439_v23 = vunpack.c.l.bf16 %v894_v20  ;;  %v442_v24 = vunpack.c.l.bf16 %v895_v21  ;;  %v896_v25 = vld [vmem:[%s1132_s27 + $0x3] sm:$0x1]  ;;  %s555_s27 = sadd.s32 5, %s1162_s25  ;;  %s551_s13 = sadd.s32 3, %s1162_s25 }
  0x3a   : > { %v429_v2 = vmul.f32 0.1, %v428_v1  ;;  %522 = vst [vmem:[%s398_s14] sm:$0x3] %v515_v10  ;;  %902 = vst [vmem:[%s398_s14 + $0x2] sm:$0x3] %v518_v11  ;;  %v445_v29 = vunpack.c.l.bf16 %v896_v25  ;;  %s1169_s10 = sld [smem:[#allocation2 + %s555_s27]] }
  0x3b   : > { %903 = vst [vmem:[%s398_s14 + $0x4] sm:$0x3] %v521_v14  ;;  %v446_v30 = vmul.f32 %v439_v23, %v439_v23  ;;  %v447_v31 = vmul.f32 %v442_v24, %v442_v24  ;;  %v527_v52 = vmax.f32 %v515_v10, 1e-12  ;;  %v533_v54 = vmax.f32 %v518_v11, 1e-12 }
  0x3c   : > { %v430_v3 = vadd.f32 1.0, %v429_v2  ;;  %v449_v33 = vmul.f32 %v445_v29, %v445_v29  ;;  %v539_v55 = vmax.f32 %v521_v14, 1e-12  ;;  %s549_s14 = sadd.s32 2, %s1162_s25  ;;  %s1177_s15 = sld [smem:[#allocation2 + %s551_s13]] }
  0x3d   : > { %v448_v32 = vadd.f32 %v447_v31, %v446_v30  ;;  %s1180_s16 = sld [smem:[#allocation2 + %s549_s14]] }
  0x3e   : > { %470 = vrot.lane.b32.xlu1 %v430_v3, %s1026_s28  ;;  %456 = vrot.lane.b32.xlu0 %v430_v3, %s1027_s29  ;;  %v459_v4 = vrot.slane %v430_v3, 6  ;;  %v432_v17 = vsub.f32 %v430_v3, %v431_v15  ;;  %s546_s14 = sld [smem:[#allocation2 + %s1162_s25]] }
  0x3f   : > { %v450_v39 = vadd.f32 %v449_v33, %v448_v32 }
  0x40   : > { %v460_v5 = vsel %vm458_vm0, %v459_v4, %v430_v3  ;;  %v434_v18 = vmul.f32 %v433_v16, %v432_v17  ;;  %v561_v21 = vstv %s1169_s10 }
  0x41   : > { %v461_v6 = vrot.slane %v460_v5, 6  ;;  %v451_v46 = vmax.f32 %v450_v39, 1e-12 }
  0x42   : > { %v435_v19 = vsub.f32 1.0, %v434_v18 }
  0x43   : > { %v462_v9 = vsel %vm458_vm0, %v461_v6, %v430_v3  ;;  %944 = vrsqrt.f32 %v451_v46 }
  0x44   : > { %v464_v13 = vrot.slane %v462_v9, 1  ;;  %436 = vst [vmem:[%s388_s20] sm:$0x3] %v435_v19  ;;  %s393_s20 = scalar_lea.vmem %s1222_s5, %s1136_s11 }
  0x46   : > { %472 = vrot.lane.b32.xlu1 %v464_v13, %s1026_s28  ;;  %466 = vrot.lane.b32.xlu0 %v464_v13, %s1027_s29  ;;  %s557_s28 = sadd.s32 6, %s1162_s25  ;;  %s1167_s29 = sld [smem:[#allocation2 + %s553_s26]] }
  0x47   : > { %s1171_s12 = sld [smem:[#allocation2 + %s557_s28]] }
  0x4c   : > { %v559_v20 = vstv %s1167_s29 }
  0x4d   : > { %v945_v53 = vpop.eup %944  ;;  %v564_v25 = vstv %s1171_s12 }
  0x4e   : > { %v453_v56 = vmul.f32 %v945_v53, %v439_v23  ;;  %v454_v57 = vmul.f32 %v945_v53, %v442_v24  ;;  %v455_v58 = vmul.f32 %v945_v53, %v445_v29 }
  0xb0   : > { %v471_v26 = vpop.permute.xlu1 %470  ;;  %v457_v27 = vpop.permute.xlu0 %456 }
  0xb8   : > { %v473_v34 = vpop.permute.xlu1 %472  ;;  %v467_v35 = vpop.permute.xlu0 %466 }
  0xb9   : > { %v475_v36 = vsel %vm474_vm1, %v471_v26, %v473_v34  ;;  %v469_v37 = vsel %vm468_vm2, %v457_v27, %v467_v35 }
  0xba   : > { %v479_v38 = vsub.f32 %v475_v36, %v430_v3  ;;  %v476_v40 = vsub.f32 %v469_v37, %v430_v3  ;;  %v596_v37 = vstv %s1177_s15  ;;  %s547_s15 = sadd.s32 1, %s1162_s25 }
  0xbc   : > { %v480_v43 = vsub.f32 0.0, %v479_v38  ;;  %v477_v44 = vsub.f32 0.0, %v476_v40 }
  0xbe   : > { %v481_v45 = vmul.f32 %v889_v41, %v480_v43  ;;  %v478_v47 = vmul.f32 %v477_v44, %v416_v42  ;;  %v598_v41 = vstv %s1180_s16  ;;  %s548_s16 = sld [smem:[#allocation2 + %s547_s15]] }
  0xc0   : > { %v483_v48 = vmul.f32 %v481_v45, %v481_v45  ;;  %v482_v49 = vmul.f32 %v478_v47, %v478_v47 }
  0xc2   : > { %v484_v50 = vadd.f32 %v483_v48, %v482_v49  ;;  %v892_v48 = vld [vmem:[%s1220_s3 + $0x8] sm:$0x3] }
  0xc4   : > { %v485_v51 = vadd.f32 1.0, %v484_v50 }
  0xc6   : > { %946 = vrsqrt.f32 %v485_v51 }
  0xc7   : > { %948 = vlog2.f32 %v527_v52 }
  0xc8   : > { %950 = vlog2.f32 %v533_v54  ;;  %v893_v54 = vld [vmem:[%s1220_s3 + $0xa] sm:$0x3] }
  0xc9   : > { %952 = vlog2.f32 %v539_v55 }
  0xd0   : > { %v947_v59 = vpop.eup %946 }
  0xd1   : > { %v487_v60 = vmul.f32 %v947_v59, %v478_v47  ;;  %v489_v61 = vmul.f32 %v947_v59, %v481_v45  ;;  %v491_v0 = vadd.f32 %v947_v59, %v455_v58  ;;  %v949_v5 = vpop.eup %948  ;;  %v891_v47 = vld [vmem:[%s1220_s3 + $0x6] sm:$0x3] }
  0xd2   : > { %v951_v7 = vpop.eup %950  ;;  %v529_v10 = vmul.f32 0.6931472, %v949_v5 }
  0xd3   : > { %v488_v62 = vadd.f32 %v487_v60, %v453_v56  ;;  %v490_v63 = vadd.f32 %v489_v61, %v454_v57  ;;  %v495_v4 = vmul.f32 %v491_v0, %v491_v0  ;;  %v953_v9 = vpop.eup %952  ;;  %v535_v11 = vmul.f32 0.6931472, %v951_v7 }
  0xd4   : > { %v541_v12 = vmul.f32 0.6931472, %v953_v9  ;;  %v530_v13 = vmul.f32 2.2, %v529_v10 }
  0xd5   : > { %v492_v1 = vmul.f32 %v488_v62, %v488_v62  ;;  %v493_v2 = vmul.f32 %v490_v63, %v490_v63  ;;  %v536_v14 = vmul.f32 2.2, %v535_v11 }
  0xd6   : > { %v542_v15 = vmul.f32 2.2, %v541_v12  ;;  %v531_v16 = vmul.f32 1.442695, %v530_v13  ;;  %v600_v12 = vstv %s548_s16 }
  0xd7   : > { %v494_v3 = vadd.f32 %v493_v2, %v492_v1  ;;  %v537_v17 = vmul.f32 1.442695, %v536_v14  ;;  %v1028_v1 = vmov 0.0  }
  0xd8   : > { %v543_v19 = vmul.f32 1.442695, %v542_v15 }
  0xd9   : > { %v496_v6 = vadd.f32 %v495_v4, %v494_v3 }
  0xdb   : > { %v497_v8 = vmax.f32 %v496_v6, 1e-12 }
  0xdd   : > { %954 = vrsqrt.f32 %v497_v8  ;;  %v591_v8 = vstv %s546_s14 }
  0xde   : > { %956 = vpow2.f32 %v531_v16 }
  0xdf   : > { %958 = vpow2.f32 %v537_v17 }
  0xe0   : > { %960 = vpow2.f32 %v543_v19 }
  0xe7   : > { %v955_v18 = vpop.eup %954 }
  0xe8   : > { %v499_v22 = vmul.f32 %v955_v18, %v488_v62  ;;  %v500_v23 = vmul.f32 %v955_v18, %v490_v63  ;;  %v501_v24 = vmul.f32 %v955_v18, %v491_v0  ;;  %v957_v40 = vpop.eup %956  ;;  %v890_v0 = vld [vmem:[%s1220_s3 + $0x4] sm:$0x3] }
  0xe9   : > { %v959_v42 = vpop.eup %958 }
  0xea   : > { %v502_v26 = vadd.f32 1.0, %v499_v22  ;;  %v505_v27 = vadd.f32 1.0, %v500_v23  ;;  %v509_v28 = vadd.f32 1.0, %v501_v24  ;;  %v560_v29 = vmul.f32 %v559_v20, %v499_v22  ;;  %v961_v49 = vpop.eup %960 }
  0xeb   : > { %v562_v30 = vmul.f32 %v561_v21, %v500_v23  ;;  %v565_v35 = vmul.f32 %v564_v25, %v501_v24 }
  0xec   : > { %v503_v31 = vmul.f32 0.5, %v502_v26  ;;  %v506_v32 = vmul.f32 0.5, %v505_v27  ;;  %v510_v33 = vmul.f32 0.5, %v509_v28 }
  0xed   : > { %v563_v34 = vadd.f32 %v562_v30, %v560_v29 }
  0xee   : > { %504 = vst [vmem:[%s393_s20] sm:$0x3] %v503_v31  ;;  %897 = vst [vmem:[%s393_s20 + $0x2] sm:$0x3] %v506_v32 }
  0xef   : > { %898 = vst [vmem:[%s393_s20 + $0x4] sm:$0x3] %v510_v33  ;;  %v566_v36 = vadd.f32 %v565_v35, %v563_v34  ;;  %s406_s20 = scalar_lea.vmem %s1225_s8, %s1146_s17 }
  0xf1   : > { %v567_v38 = vmax.f32 %v566_v36, 0.0  ;;  %v569_v39 = vmul.f32 2.0, %v566_v36  ;;  %vm582_vm3 = vcmp.gt.f32.partialorder %v566_v36, 0.0 }
  0xf2   : > { %v905_v2 = vsel %vm582_vm3, 1.0, %v1028_v1 }
  0xf3   : > { %568 = vst [vmem:[%s402_s23] sm:$0x3] %v567_v38  ;;  %v570_v43 = vmul.f32 %v569_v39, %v499_v22  ;;  %v572_v44 = vmul.f32 %v569_v39, %v500_v23  ;;  %v574_v45 = vmul.f32 %v569_v39, %v501_v24  ;;  %v597_v46 = vmul.f32 %v596_v37, %v567_v38 }
  0xf5   : > { %v571_v50 = vsub.f32 %v570_v43, %v559_v20  ;;  %v573_v51 = vsub.f32 %v572_v44, %v561_v21  ;;  %v575_v52 = vsub.f32 %v574_v45, %v564_v25  ;;  %v599_v53 = vadd.f32 %v598_v41, %v597_v46 }
  0xf7   : > { %v576_v55 = vmul.f32 %v891_v47, %v571_v50  ;;  %v577_v56 = vmul.f32 %v892_v48, %v573_v51  ;;  %v602_v57 = vmul.f32 %v957_v40, %v599_v53  ;;  %v613_v58 = vmul.f32 %v959_v42, %v599_v53 }
  0xf8   : > { %v625_v59 = vmul.f32 %v961_v49, %v599_v53  ;;  %v579_v61 = vmul.f32 %v893_v54, %v575_v52 }
  0xf9   : > { %v578_v60 = vadd.f32 %v577_v56, %v576_v55 }
  0xfb   : > { %v580_v62 = vadd.f32 %v579_v61, %v578_v60 }
  0xfd   : > { %v581_v63 = vmax.f32 %v580_v62, 0.0 }
  0xff   : > { %v585_v3 = vmul.f32 %v905_v2, %v581_v63 }
 0x101   : > { %v586_v4 = vmul.f32 %v890_v0, %v585_v3 }
 0x103   : > { %v587_v5 = vmax.f32 %v586_v4, 1e-06 }
 0x105   : > { %v588_v6 = vmin.f32 %v587_v5, 0.999999 }
 0x107   : > { %962 = vlog2.f32 %v588_v6 }
 0x111   : > { %v963_v7 = vpop.eup %962 }
 0x112   : > { %v590_v9 = vmul.f32 0.6931472, %v963_v7 }
 0x114   : > { %v592_v10 = vmul.f32 %v591_v8, %v590_v9 }
 0x116   : > { %v593_v11 = vmul.f32 1.442695, %v592_v10 }
 0x118   : > { %964 = vpow2.f32 %v593_v11 }
 0x122   : > { %v965_v13 = vpop.eup %964 }
 0x123   : > { %595 = vst [vmem:[%s406_s20] sm:$0x3] %v965_v13  ;;  %v601_v14 = vmul.f32 %v965_v13, %v600_v12 }
 0x125   : > { %v603_v15 = vadd.f32 %v602_v57, %v601_v14  ;;  %v614_v16 = vadd.f32 %v613_v58, %v601_v14  ;;  %v626_v17 = vadd.f32 %v625_v59, %v601_v14 }
 0x127   : > { %v604_v18 = vmax.f32 %v603_v15, 1e-07  ;;  %v615_v19 = vmax.f32 %v614_v16, 1e-07  ;;  %v627_v20 = vmax.f32 %v626_v17, 1e-07 }
 0x129   : > { %966 = vlog2.f32 %v604_v18 }
 0x12a   : > { %968 = vlog2.f32 %v615_v19 }
 0x12b   : > { %970 = vlog2.f32 %v627_v20 }
 0x133   : > { %v967_v21 = vpop.eup %966 }
 0x134   : > { %v969_v22 = vpop.eup %968  ;;  %v606_v23 = vmul.f32 0.6931472, %v967_v21 }
 0x135   : > { %v971_v24 = vpop.eup %970  ;;  %v617_v25 = vmul.f32 0.6931472, %v969_v22 }
 0x136   : > { %v607_v26 = vmul.f32 0.45454547, %v606_v23  ;;  %v629_v27 = vmul.f32 0.6931472, %v971_v24 }
 0x137   : > { %v618_v28 = vmul.f32 0.45454547, %v617_v25 }
 0x138   : > { %v608_v29 = vmul.f32 1.442695, %v607_v26  ;;  %v630_v30 = vmul.f32 0.45454547, %v629_v27 }
 0x139   : > { %v619_v31 = vmul.f32 1.442695, %v618_v28 }
 0x13a   : > { %972 = vpow2.f32 %v608_v29  ;;  %v631_v32 = vmul.f32 1.442695, %v630_v30 }
 0x13b   : > { %974 = vpow2.f32 %v619_v31 }
 0x13c   : > { %976 = vpow2.f32 %v631_v32 }
 0x144   : > { %v973_v33 = vpop.eup %972 }
 0x145   : > { %v975_v34 = vpop.eup %974  ;;  %v610_v35 = vmax.f32 %v973_v33, 0.0 }
 0x146   : > { %v977_v36 = vpop.eup %976  ;;  %v621_v37 = vmax.f32 %v975_v34, 0.0 }
 0x147   : > { %v611_v38 = vmin.f32 %v610_v35, 1.0  ;;  %v633_v39 = vmax.f32 %v977_v36, 0.0 }
 0x148   : > { %v622_v40 = vmin.f32 %v621_v37, 1.0 }
 0x149   : > { %612 = vst [vmem:[%s411_s21] sm:$0x3] %v611_v38  ;;  %v634_v41 = vmin.f32 %v633_v39, 1.0 }
 0x14a   : > { %906 = vst [vmem:[%s411_s21 + $0x2] sm:$0x3] %v622_v40 }
 0x14b   : > { %907 = vst [vmem:[%s411_s21 + $0x4] sm:$0x3] %v634_v41 }
 0x14c PF: > { %s22_s30 = sadd.s32 1, %s1022_s30  }
 0x14d   : > { %p19_p5 = scmp.ge.s32.totalorder %s22_s30, 4  }
 0x14f   :  { %21 = sbr.rel (!%p19_p5) target bundleno = 2 (0x2), region = 152 }
 0x156   :  { %732 = vsyncpa [#allocation3], 1 }
 0x157   :  { %734 = vsyncpa [#allocation3 + $0x1], 1 }
 0x158   :  { %735 = vsyncpa [#allocation5], 1 }

</bundles_post_ra>
